<compile_context>
chip_gen: v6e
topology: v6e:2x2x1
jax: 0.10.0
libtpu: 0.0.40
codegen_flags: <defaults>
</compile_context>

<pallas_src>
import jax
import jax.numpy as jnp
from jax.experimental import pallas as pl
from jax.experimental.pallas import tpu as pltpu

NUM_GROUPS = 4
GN_EPS = 1e-5
LRELU_SLOPE = 0.2


def _round_up(x, m):
    return (x + m - 1) // m * m


# ---------------------------------------------------------------------------
# Fused kernel (one grid step == one batch sample)
# ---------------------------------------------------------------------------
def _make_fused_kernel(Ho, Wo):
    P = Ho * Wo
    PAD = Wo + 1  # zero halo rows above/below the flat m1 buffer for the 3x3 conv

    def kernel(a0_ref, a1_ref, xs_ref, w1_ref, w2_ref, w3_ref, sn_ref,
               maskl_ref, maskr_ref,
               g1_ref, b1_ref, g2_ref, b2_ref, g3_ref, b3_ref,
               out_ref, m1p_ref):
        Cpad = out_ref.shape[-1]
        sn = sn_ref[...]                                    # (Cpad, Cpad) f32, 1/n folded

        def gn_lrelu(y, g_ref, b_ref):
            # y: (P, Cpad) f32. Group stats via masked-channel matmul, all f32.
            s1 = jnp.sum(y, axis=0, keepdims=True)                      # (1, Cpad)
            s2 = jnp.sum(y * y, axis=0, keepdims=True)                  # (1, Cpad)
            mean = jnp.dot(s1, sn, preferred_element_type=jnp.float32)
            mean_sq = jnp.dot(s2, sn, preferred_element_type=jnp.float32)
            var = mean_sq - mean * mean
            scale = jax.lax.rsqrt(var + GN_EPS) * g_ref[...]
            yn = (y - mean) * scale + b_ref[...]
            return jnp.where(yn >= 0.0, yn, LRELU_SLOPE * yn)

        # ---- main conv1: 4x4 stride-2 pad-1 == 2x2 stride-1 over padded s2d input,
        #      lowered to 4 shifted bf16 matmuls with f32 accumulation.
        acc1 = jnp.zeros((P, Cpad), jnp.float32)
        for di in range(2):
            for dj in range(2):
                a_ref = a0_ref if dj == 0 else a1_ref
                patch = a_ref[0, di * Wo:di * Wo + P, :]                # (P, K1) bf16
                acc1 = acc1 + jnp.dot(patch, w1_ref[di * 2 + dj],
                                      preferred_element_type=jnp.float32)
        m1 = gn_lrelu(acc1, g1_ref, b1_ref)                             # (P, Cpad) f32

        # ---- main conv2: 3x3 stride-1 pad-1; m1 stays in VMEM (no HBM round trip).
        zpad = jnp.zeros((PAD, Cpad), jnp.bfloat16)
        m1p_ref[0:PAD, :] = zpad
        m1p_ref[PAD + P:PAD + P + PAD, :] = zpad
        m1p_ref[PAD:PAD + P, :] = m1.astype(jnp.bfloat16)

        mask_l = maskl_ref[...]                                         # (P, 1) f32
        mask_r = maskr_ref[...]
        acc2 = jnp.zeros((P, Cpad), jnp.float32)
        t = 0
        for di in (-1, 0, 1):
            for dj in (-1, 0, 1):
                start = PAD + di * Wo + dj
                patch = m1p_ref[start:start + P, :]                     # (P, Cpad) bf16
                contrib = jnp.dot(patch, w2_ref[t],
                                  preferred_element_type=jnp.float32)
                if dj == -1:
                    contrib = contrib * mask_l                          # j==0 edge
                elif dj == 1:
                    contrib = contrib * mask_r                          # j==Wo-1 edge
                acc2 = acc2 + contrib
                t += 1
        m2 = gn_lrelu(acc2, g2_ref, b2_ref)

        # ---- direct branch: AvgPool2d(2,2) + 1x1 conv == one matmul on s2d input.
        accd = jnp.dot(xs_ref[0], w3_ref[...], preferred_element_type=jnp.float32)
        d = gn_lrelu(accd, g3_ref, b3_ref)

        # residual average fused
        out_ref[0] = (m2 + d) * 0.5

    return kernel


# ---------------------------------------------------------------------------
# Glue: spectral norm (power iteration), rearrangements, pallas_call wrapper
# ---------------------------------------------------------------------------
def spectral_normalize(w, n_iter=30):
    """torch-style spectral norm: divide by the top singular value, estimated
    with power iteration (much cheaper than a full SVD)."""
    mat = w.reshape(w.shape[0], -1).astype(jnp.float32)
    u0 = jnp.full((mat.shape[0],), 1.0 / (mat.shape[0] ** 0.5), jnp.float32)

    def body(_, u):
        v = mat.T @ u
        v = v / (jnp.linalg.norm(v) + 1e-12)
        u = mat @ v
        return u / (jnp.linalg.norm(u) + 1e-12)

    u = jax.lax.fori_loop(0, n_iter, body, u0)
    v = mat.T @ u
    v = v / (jnp.linalg.norm(v) + 1e-12)
    sigma = u @ (mat @ v)
    return w / sigma


@jax.jit
def down_block_comp(x_nchw, w1, w2, w3, g1, b1, g2, b2, g3, b3):
    N, Cin, H, W = x_nchw.shape
    Cout = w1.shape[0]
    assert H % 2 == 0 and W % 2 == 0, "spatial dims must be even"
    assert Cout % NUM_GROUPS == 0, "out channels must divide into 4 groups"
    Ho, Wo = H // 2, W // 2
    P = Ho * Wo
    K1 = 4 * Cin
    K1p = _round_up(K1, 8)
    Cpad = _round_up(Cout, 128)        # lane-dense output / full MXU columns

    x = jnp.transpose(x_nchw, (0, 2, 3, 1))                 # NHWC

    # --- space-to-depth(2) rearrangements (bijective; no im2col blowup) ------
    # padded input (for the 4x4/s2 conv): pad 1, s2d -> (N, Ho+1, Wo+1, 4*Cin);
    # pre-split the two W taps so the kernel only needs contiguous row slices.
    xp = jnp.pad(x, ((0, 0), (1, 1), (1, 1), (0, 0)))
    xp = xp.reshape(N, Ho + 1, 2, Wo + 1, 2, Cin)
    xp = jnp.transpose(xp, (0, 1, 3, 2, 4, 5)).reshape(N, Ho + 1, Wo + 1, K1)
    a0 = xp[:, :, 0:Wo, :].reshape(N, (Ho + 1) * Wo, K1)
    a1 = xp[:, :, 1:Wo + 1, :].reshape(N, (Ho + 1) * Wo, K1)
    # unpadded s2d (for AvgPool + 1x1), already flattened to (N, P, 4*Cin)
    xs = x.reshape(N, Ho, 2, Wo, 2, Cin)
    xs = jnp.transpose(xs, (0, 1, 3, 2, 4, 5)).reshape(N, P, K1)

    kpad = K1p - K1
    a0 = jnp.pad(a0, ((0, 0), (0, 0), (0, kpad))).astype(jnp.bfloat16)
    a1 = jnp.pad(a1, ((0, 0), (0, 0), (0, kpad))).astype(jnp.bfloat16)
    xs = jnp.pad(xs, ((0, 0), (0, 0), (0, kpad))).astype(jnp.bfloat16)

    # --- spectral norm + weight rearrangement --------------------------------
    w1sn = spectral_normalize(w1)
    w2sn = spectral_normalize(w2)
    w3sn = spectral_normalize(w3)

    # conv1 taps: block offsets (bi, bj); rows ordered (rh, rw, cin) like s2d
    # channels; original kernel index = (2*bi + rh, 2*bj + rw).
    w1t = jnp.transpose(w1sn, (2, 3, 1, 0)).reshape(2, 2, 2, 2, Cin, Cout)
    w1t = jnp.transpose(w1t, (0, 2, 1, 3, 4, 5)).reshape(4, K1, Cout)
    # conv2 taps: t = kh*3 + kw, rows = input channel
    w2t = jnp.transpose(w2sn, (2, 3, 1, 0)).reshape(9, Cout, Cout)
    # direct: AvgPool(2) + 1x1  ==  tiled (w3 / 4) over the 4 s2d sub-positions
    w3t = jnp.tile(w3sn[:, :, 0, 0].T / 4.0, (4, 1))        # (K1, Cout)

    cpad = Cpad - Cout
    w1t = jnp.pad(w1t, ((0, 0), (0, kpad), (0, cpad))).astype(jnp.bfloat16)
    w2t = jnp.pad(w2t, ((0, 0), (0, cpad), (0, cpad))).astype(jnp.bfloat16)
    w3t = jnp.pad(w3t, ((0, kpad), (0, cpad))).astype(jnp.bfloat16)

    def pad_c(v):
        return jnp.pad(v.astype(jnp.float32), (0, cpad)).reshape(1, Cpad)
    g1p, b1p, g2p, b2p, g3p, b3p = (pad_c(v) for v in (g1, b1, g2, b2, g3, b3))

    # GroupNorm same-group mask over REAL channels only, with 1/n folded in.
    gsize = Cout // NUM_GROUPS
    cid = jnp.arange(Cpad)
    valid = cid < Cout
    same = (cid[:, None] // gsize) == (cid[None, :] // gsize)
    sn_mat = (same & valid[:, None] & valid[None, :]).astype(jnp.float32)
    sn_mat = sn_mat / float(P * gsize)

    # column-edge masks for the 3x3 conv implemented as flat row shifts
    col = jnp.arange(P) % Wo
    mask_l = (col > 0).astype(jnp.float32).reshape(P, 1)
    mask_r = (col < Wo - 1).astype(jnp.float32).reshape(P, 1)

    kernel = _make_fused_kernel(Ho, Wo)
    out = pl.pallas_call(
        kernel,
        out_shape=jax.ShapeDtypeStruct((N, P, Cpad), jnp.float32),
        grid=(N,),
        in_specs=[
            pl.BlockSpec((1, (Ho + 1) * Wo, K1p), lambda n: (n, 0, 0)),   # a0
            pl.BlockSpec((1, (Ho + 1) * Wo, K1p), lambda n: (n, 0, 0)),   # a1
            pl.BlockSpec((1, P, K1p), lambda n: (n, 0, 0)),               # xs (s2d)
            pl.BlockSpec((4, K1p, Cpad), lambda n: (0, 0, 0)),            # conv1 taps
            pl.BlockSpec((9, Cpad, Cpad), lambda n: (0, 0, 0)),           # conv2 taps
            pl.BlockSpec((K1p, Cpad), lambda n: (0, 0)),                  # direct w
            pl.BlockSpec((Cpad, Cpad), lambda n: (0, 0)),                 # group mask
            pl.BlockSpec((P, 1), lambda n: (0, 0)),                       # mask_l
            pl.BlockSpec((P, 1), lambda n: (0, 0)),                       # mask_r
        ] + [pl.BlockSpec((1, Cpad), lambda n: (0, 0))] * 6,              # GN affine
        out_specs=pl.BlockSpec((1, P, Cpad), lambda n: (n, 0, 0)),
        scratch_shapes=[pltpu.VMEM((P + 2 * (Wo + 1), Cpad), jnp.bfloat16)],
        compiler_params=pltpu.CompilerParams(
            dimension_semantics=("parallel",),
            vmem_limit_bytes=48 * 1024 * 1024,
        ),
    )(a0, a1, xs, w1t, w2t, w3t, sn_mat, mask_l, mask_r,
      g1p, b1p, g2p, b2p, g3p, b3p)

    out = out[:, :, :Cout].reshape(N, Ho, Wo, Cout)
    return jnp.transpose(out, (0, 3, 1, 2))                 # NCHW


# ---------------------------------------------------------------------------
# Pure-JAX reference (for correctness check)
# ---------------------------------------------------------------------------
def _ref_conv(x, w, stride, pad):
    return jax.lax.conv_general_dilated(
        x, w, (stride, stride), [(pad, pad), (pad, pad)],
        dimension_numbers=("NCHW", "OIHW", "NCHW"),
        precision=jax.lax.Precision.HIGHEST)


def _ref_gn(x, gamma, beta):
    N, C, H, W = x.shape
    g = NUM_GROUPS
    xg = x.reshape(N, g, C // g, H, W)
    m = xg.mean(axis=(2, 3, 4), keepdims=True)
    v = xg.var(axis=(2, 3, 4), keepdims=True)
    xn = ((xg - m) / jnp.sqrt(v + GN_EPS)).reshape(N, C, H, W)
    return xn * gamma.reshape(1, C, 1, 1) + beta.reshape(1, C, 1, 1)


def _ref_lrelu(x):
    return jnp.where(x >= 0, x, LRELU_SLOPE * x)


def reference(x, w1sn, w2sn, w3sn, g1, b1, g2, b2, g3, b3):
    m = _ref_lrelu(_ref_gn(_ref_conv(x, w1sn, 2, 1), g1, b1))
    m = _ref_lrelu(_ref_gn(_ref_conv(m, w2sn, 1, 1), g2, b2))
    N, C, H, W = x.shape
    xa = x.reshape(N, C, H // 2, 2, W // 2, 2).mean(axis=(3, 5))
    d = _ref_lrelu(_ref_gn(_ref_conv(xa, w3sn, 1, 0), g3, b3))
    return (m + d) / 2


if __name__ == "__main__":
    key = jax.random.PRNGKey(0)
    N, Cin, H, W = 2, 4, 16, 16
    Cout = 8

    kx, k1, k2, k3 = jax.random.split(key, 4)
    x = jax.random.normal(kx, (N, Cin, H, W), jnp.float32)
    # PyTorch conv weight layout: (O, I, KH, KW)
    w1 = jax.random.normal(k1, (Cout, Cin, 4, 4), jnp.float32) * 0.2
    w2 = jax.random.normal(k2, (Cout, Cout, 3, 3), jnp.float32) * 0.2
    w3 = jax.random.normal(k3, (Cout, Cin, 1, 1), jnp.float32) * 0.2
    # GroupNorm affine params: PyTorch default init (ones / zeros)
    g1 = jnp.ones((Cout,), jnp.float32); b1 = jnp.zeros((Cout,), jnp.float32)
    g2 = jnp.ones((Cout,), jnp.float32); b2 = jnp.zeros((Cout,), jnp.float32)
    g3 = jnp.ones((Cout,), jnp.float32); b3 = jnp.zeros((Cout,), jnp.float32)

    out = down_block_comp(x, w1, w2, w3, g1, b1, g2, b2, g3, b3)
    out = jax.block_until_ready(out)
    assert out.shape == (N, Cout, H // 2, W // 2), out.shape

    ref = reference(x, spectral_normalize(w1), spectral_normalize(w2),
                    spectral_normalize(w3), g1, b1, g2, b2, g3, b3)
    max_err = float(jnp.max(jnp.abs(out - ref)))
    mean_err = float(jnp.mean(jnp.abs(out - ref)))
    # bf16 MXU inputs (f32 accumulation) vs. a pure-f32 reference -> small noise
    assert max_err < 6e-2, f"max abs err {max_err}"
    assert mean_err < 1e-2, f"mean abs err {mean_err}"
    print("KERNEL_OK")
</pallas_src>

<mosaic_0001>
module attributes {stable_mosaic.version = 11 : i64} {
  func.func @kernel(%arg0: i32, %arg1: memref<1x72x16xbf16, #tpu.memory_space<vmem>>, %arg2: memref<1x72x16xbf16, #tpu.memory_space<vmem>>, %arg3: memref<1x64x16xbf16, #tpu.memory_space<vmem>>, %arg4: memref<4x16x128xbf16, #tpu.memory_space<vmem>>, %arg5: memref<9x128x128xbf16, #tpu.memory_space<vmem>>, %arg6: memref<16x128xbf16, #tpu.memory_space<vmem>>, %arg7: memref<128x128xf32, #tpu.memory_space<vmem>>, %arg8: memref<64x1xf32, #tpu.memory_space<vmem>>, %arg9: memref<64x1xf32, #tpu.memory_space<vmem>>, %arg10: memref<1x128xf32, #tpu.memory_space<vmem>>, %arg11: memref<1x128xf32, #tpu.memory_space<vmem>>, %arg12: memref<1x128xf32, #tpu.memory_space<vmem>>, %arg13: memref<1x128xf32, #tpu.memory_space<vmem>>, %arg14: memref<1x128xf32, #tpu.memory_space<vmem>>, %arg15: memref<1x128xf32, #tpu.memory_space<vmem>>, %arg16: memref<1x64x128xf32, #tpu.memory_space<vmem>>, %arg17: memref<82x128xbf16, #tpu.memory_space<vmem>>) attributes {dimension_semantics = [#tpu.dimension_semantics<parallel>], iteration_bounds = array<i64: 2>, scalar_prefetch = 0 : i64, scratch_operands = 1 : i64, tpu.core_type = #tpu.core_type<tc>, window_params = [{transform_indices = @transform_0, window_bounds = array<i64: 1, 72, 16>}, {transform_indices = @transform_1, window_bounds = array<i64: 1, 72, 16>}, {transform_indices = @transform_2, window_bounds = array<i64: 1, 64, 16>}, {pipeline_mode = #tpu.pipeline_mode<synchronous>, transform_indices = @transform_3, window_bounds = array<i64: 4, 16, 128>}, {pipeline_mode = #tpu.pipeline_mode<synchronous>, transform_indices = @transform_4, window_bounds = array<i64: 9, 128, 128>}, {pipeline_mode = #tpu.pipeline_mode<synchronous>, transform_indices = @transform_5, window_bounds = array<i64: 16, 128>}, {pipeline_mode = #tpu.pipeline_mode<synchronous>, transform_indices = @transform_6, window_bounds = array<i64: 128, 128>}, {pipeline_mode = #tpu.pipeline_mode<synchronous>, transform_indices = @transform_7, window_bounds = array<i64: 64, 1>}, {pipeline_mode = #tpu.pipeline_mode<synchronous>, transform_indices = @transform_8, window_bounds = array<i64: 64, 1>}, {pipeline_mode = #tpu.pipeline_mode<synchronous>, transform_indices = @transform_9, window_bounds = array<i64: 1, 128>}, {pipeline_mode = #tpu.pipeline_mode<synchronous>, transform_indices = @transform_10, window_bounds = array<i64: 1, 128>}, {pipeline_mode = #tpu.pipeline_mode<synchronous>, transform_indices = @transform_11, window_bounds = array<i64: 1, 128>}, {pipeline_mode = #tpu.pipeline_mode<synchronous>, transform_indices = @transform_12, window_bounds = array<i64: 1, 128>}, {pipeline_mode = #tpu.pipeline_mode<synchronous>, transform_indices = @transform_13, window_bounds = array<i64: 1, 128>}, {pipeline_mode = #tpu.pipeline_mode<synchronous>, transform_indices = @transform_14, window_bounds = array<i64: 1, 128>}, {transform_indices = @transform_15, window_bounds = array<i64: 1, 64, 128>}]} {
    %c0 = arith.constant 0 : index
    %c0_0 = arith.constant 0 : index
    %0 = vector.load %arg7[%c0, %c0_0] : memref<128x128xf32, #tpu.memory_space<vmem>>, vector<128x128xf32>
    %cst = arith.constant 0.000000e+00 : f32
    %1 = vector.broadcast %cst : f32 to vector<64x128xf32>
    %c0_1 = arith.constant 0 : index
    %c0_2 = arith.constant 0 : index
    %c0_3 = arith.constant 0 : index
    %2 = vector.load %arg1[%c0_1, %c0_2, %c0_3] : memref<1x72x16xbf16, #tpu.memory_space<vmem>>, vector<1x64x16xbf16>
    %3 = vector.shape_cast %2 : vector<1x64x16xbf16> to vector<64x16xbf16>
    %c0_4 = arith.constant 0 : index
    %c0_5 = arith.constant 0 : index
    %c0_6 = arith.constant 0 : index
    %4 = vector.load %arg4[%c0_4, %c0_5, %c0_6] : memref<4x16x128xbf16, #tpu.memory_space<vmem>>, vector<1x16x128xbf16>
    %5 = vector.shape_cast %4 : vector<1x16x128xbf16> to vector<16x128xbf16>
    %cst_7 = arith.constant dense<0.000000e+00> : vector<64x128xf32>
    %6 = tpu.matmul %3, %5, %cst_7 {dimension_numbers = #tpu.dot_dimension_numbers<[1], [0], [0], [1], [0, 0, 1, 1], [], []>} : vector<64x16xbf16>, vector<16x128xbf16>, vector<64x128xf32> -> vector<64x128xf32>
    %7 = arith.addf %1, %6 : vector<64x128xf32>
    %c0_8 = arith.constant 0 : index
    %c0_9 = arith.constant 0 : index
    %c0_10 = arith.constant 0 : index
    %8 = vector.load %arg2[%c0_8, %c0_9, %c0_10] : memref<1x72x16xbf16, #tpu.memory_space<vmem>>, vector<1x64x16xbf16>
    %9 = vector.shape_cast %8 : vector<1x64x16xbf16> to vector<64x16xbf16>
    %c1 = arith.constant 1 : index
    %c0_11 = arith.constant 0 : index
    %c0_12 = arith.constant 0 : index
    %10 = vector.load %arg4[%c1, %c0_11, %c0_12] : memref<4x16x128xbf16, #tpu.memory_space<vmem>>, vector<1x16x128xbf16>
    %11 = vector.shape_cast %10 : vector<1x16x128xbf16> to vector<16x128xbf16>
    %cst_13 = arith.constant dense<0.000000e+00> : vector<64x128xf32>
    %12 = tpu.matmul %9, %11, %cst_13 {dimension_numbers = #tpu.dot_dimension_numbers<[1], [0], [0], [1], [0, 0, 1, 1], [], []>} : vector<64x16xbf16>, vector<16x128xbf16>, vector<64x128xf32> -> vector<64x128xf32>
    %13 = arith.addf %7, %12 : vector<64x128xf32>
    %c0_14 = arith.constant 0 : index
    %c8 = arith.constant 8 : index
    %c0_15 = arith.constant 0 : index
    %14 = vector.load %arg1[%c0_14, %c8, %c0_15] : memref<1x72x16xbf16, #tpu.memory_space<vmem>>, vector<1x64x16xbf16>
    %15 = vector.shape_cast %14 : vector<1x64x16xbf16> to vector<64x16xbf16>
    %c2 = arith.constant 2 : index
    %c0_16 = arith.constant 0 : index
    %c0_17 = arith.constant 0 : index
    %16 = vector.load %arg4[%c2, %c0_16, %c0_17] : memref<4x16x128xbf16, #tpu.memory_space<vmem>>, vector<1x16x128xbf16>
    %17 = vector.shape_cast %16 : vector<1x16x128xbf16> to vector<16x128xbf16>
    %cst_18 = arith.constant dense<0.000000e+00> : vector<64x128xf32>
    %18 = tpu.matmul %15, %17, %cst_18 {dimension_numbers = #tpu.dot_dimension_numbers<[1], [0], [0], [1], [0, 0, 1, 1], [], []>} : vector<64x16xbf16>, vector<16x128xbf16>, vector<64x128xf32> -> vector<64x128xf32>
    %19 = arith.addf %13, %18 : vector<64x128xf32>
    %c0_19 = arith.constant 0 : index
    %c8_20 = arith.constant 8 : index
    %c0_21 = arith.constant 0 : index
    %20 = vector.load %arg2[%c0_19, %c8_20, %c0_21] : memref<1x72x16xbf16, #tpu.memory_space<vmem>>, vector<1x64x16xbf16>
    %21 = vector.shape_cast %20 : vector<1x64x16xbf16> to vector<64x16xbf16>
    %c3 = arith.constant 3 : index
    %c0_22 = arith.constant 0 : index
    %c0_23 = arith.constant 0 : index
    %22 = vector.load %arg4[%c3, %c0_22, %c0_23] : memref<4x16x128xbf16, #tpu.memory_space<vmem>>, vector<1x16x128xbf16>
    %23 = vector.shape_cast %22 : vector<1x16x128xbf16> to vector<16x128xbf16>
    %cst_24 = arith.constant dense<0.000000e+00> : vector<64x128xf32>
    %24 = tpu.matmul %21, %23, %cst_24 {dimension_numbers = #tpu.dot_dimension_numbers<[1], [0], [0], [1], [0, 0, 1, 1], [], []>} : vector<64x16xbf16>, vector<16x128xbf16>, vector<64x128xf32> -> vector<64x128xf32>
    %25 = arith.addf %19, %24 : vector<64x128xf32>
    %cst_25 = arith.constant dense<0.000000e+00> : vector<128xf32>
    %26 = vector.multi_reduction <add>, %25, %cst_25 [0] : vector<64x128xf32> to vector<128xf32>
    %27 = vector.shape_cast %26 : vector<128xf32> to vector<1x128xf32>
    %28 = arith.mulf %25, %25 : vector<64x128xf32>
    %cst_26 = arith.constant dense<0.000000e+00> : vector<128xf32>
    %29 = vector.multi_reduction <add>, %28, %cst_26 [0] : vector<64x128xf32> to vector<128xf32>
    %30 = vector.shape_cast %29 : vector<128xf32> to vector<1x128xf32>
    %cst_27 = arith.constant dense<0.000000e+00> : vector<1x128xf32>
    %31 = tpu.matmul %27, %0, %cst_27 {dimension_numbers = #tpu.dot_dimension_numbers<[1], [0], [0], [1], [0, 0, 1, 1], [], []>} : vector<1x128xf32>, vector<128x128xf32>, vector<1x128xf32> -> vector<1x128xf32>
    %cst_28 = arith.constant dense<0.000000e+00> : vector<1x128xf32>
    %32 = tpu.matmul %30, %0, %cst_28 {dimension_numbers = #tpu.dot_dimension_numbers<[1], [0], [0], [1], [0, 0, 1, 1], [], []>} : vector<1x128xf32>, vector<128x128xf32>, vector<1x128xf32> -> vector<1x128xf32>
    %33 = arith.mulf %31, %31 : vector<1x128xf32>
    %34 = arith.subf %32, %33 : vector<1x128xf32>
    %cst_29 = arith.constant 9.99999974E-6 : f32
    %35 = vector.broadcast %cst_29 : f32 to vector<1x128xf32>
    %36 = arith.addf %34, %35 : vector<1x128xf32>
    %37 = math.rsqrt %36 : vector<1x128xf32>
    %c0_30 = arith.constant 0 : index
    %c0_31 = arith.constant 0 : index
    %38 = vector.load %arg10[%c0_30, %c0_31] : memref<1x128xf32, #tpu.memory_space<vmem>>, vector<1x128xf32>
    %39 = arith.mulf %37, %38 : vector<1x128xf32>
    %40 = vector.broadcast %31 : vector<1x128xf32> to vector<64x128xf32>
    %41 = arith.subf %25, %40 : vector<64x128xf32>
    %42 = vector.broadcast %39 : vector<1x128xf32> to vector<64x128xf32>
    %43 = arith.mulf %41, %42 : vector<64x128xf32>
    %c0_32 = arith.constant 0 : index
    %c0_33 = arith.constant 0 : index
    %44 = vector.load %arg11[%c0_32, %c0_33] : memref<1x128xf32, #tpu.memory_space<vmem>>, vector<1x128xf32>
    %45 = vector.broadcast %44 : vector<1x128xf32> to vector<64x128xf32>
    %46 = arith.addf %43, %45 : vector<64x128xf32>
    %cst_34 = arith.constant 0.000000e+00 : f32
    %47 = vector.broadcast %cst_34 : f32 to vector<64x128xf32>
    %48 = arith.cmpf oge, %46, %47 : vector<64x128xf32>
    %cst_35 = arith.constant 2.000000e-01 : f32
    %49 = vector.broadcast %cst_35 : f32 to vector<64x128xf32>
    %50 = arith.mulf %49, %46 : vector<64x128xf32>
    %51 = arith.select %48, %46, %50 : vector<64x128xi1>, vector<64x128xf32>
    %cst_36 = arith.constant 0.000000e+00 : bf16
    %52 = vector.broadcast %cst_36 : bf16 to vector<9x128xbf16>
    %c0_37 = arith.constant 0 : index
    %c0_38 = arith.constant 0 : index
    %53 = vector.load %arg17[%c0_37, %c0_38] : memref<82x128xbf16, #tpu.memory_space<vmem>>, vector<9x128xbf16>
    tpu.vector_store %arg17[%c0_37, %c0_38], %52 {strides = array<i32>} : memref<82x128xbf16, #tpu.memory_space<vmem>>, vector<9x128xbf16>,
    %c73 = arith.constant 73 : index
    %c0_39 = arith.constant 0 : index
    %54 = vector.load %arg17[%c73, %c0_39] : memref<82x128xbf16, #tpu.memory_space<vmem>>, vector<9x128xbf16>
    tpu.vector_store %arg17[%c73, %c0_39], %52 {strides = array<i32>} : memref<82x128xbf16, #tpu.memory_space<vmem>>, vector<9x128xbf16>,
    %55 = arith.truncf %51 : vector<64x128xf32> to vector<64x128xbf16>
    %c9 = arith.constant 9 : index
    %c0_40 = arith.constant 0 : index
    %56 = vector.load %arg17[%c9, %c0_40] : memref<82x128xbf16, #tpu.memory_space<vmem>>, vector<64x128xbf16>
    tpu.vector_store %arg17[%c9, %c0_40], %55 {strides = array<i32>} : memref<82x128xbf16, #tpu.memory_space<vmem>>, vector<64x128xbf16>,
    %c0_41 = arith.constant 0 : index
    %c0_42 = arith.constant 0 : index
    %57 = vector.load %arg8[%c0_41, %c0_42] : memref<64x1xf32, #tpu.memory_space<vmem>>, vector<64x1xf32>
    %c0_43 = arith.constant 0 : index
    %c0_44 = arith.constant 0 : index
    %58 = vector.load %arg9[%c0_43, %c0_44] : memref<64x1xf32, #tpu.memory_space<vmem>>, vector<64x1xf32>
    %cst_45 = arith.constant 0.000000e+00 : f32
    %59 = vector.broadcast %cst_45 : f32 to vector<64x128xf32>
    %c0_46 = arith.constant 0 : index
    %c0_47 = arith.constant 0 : index
    %60 = vector.load %arg17[%c0_46, %c0_47] : memref<82x128xbf16, #tpu.memory_space<vmem>>, vector<64x128xbf16>
    %c0_48 = arith.constant 0 : index
    %c0_49 = arith.constant 0 : index
    %c0_50 = arith.constant 0 : index
    %61 = vector.load %arg5[%c0_48, %c0_49, %c0_50] : memref<9x128x128xbf16, #tpu.memory_space<vmem>>, vector<1x128x128xbf16>
    %62 = vector.shape_cast %61 : vector<1x128x128xbf16> to vector<128x128xbf16>
    %cst_51 = arith.constant dense<0.000000e+00> : vector<64x128xf32>
    %63 = tpu.matmul %60, %62, %cst_51 {dimension_numbers = #tpu.dot_dimension_numbers<[1], [0], [0], [1], [0, 0, 1, 1], [], []>} : vector<64x128xbf16>, vector<128x128xbf16>, vector<64x128xf32> -> vector<64x128xf32>
    %64 = vector.broadcast %57 : vector<64x1xf32> to vector<64x128xf32>
    %65 = arith.mulf %63, %64 : vector<64x128xf32>
    %66 = arith.addf %59, %65 : vector<64x128xf32>
    %c1_52 = arith.constant 1 : index
    %c0_53 = arith.constant 0 : index
    %67 = vector.load %arg17[%c1_52, %c0_53] : memref<82x128xbf16, #tpu.memory_space<vmem>>, vector<64x128xbf16>
    %c1_54 = arith.constant 1 : index
    %c0_55 = arith.constant 0 : index
    %c0_56 = arith.constant 0 : index
    %68 = vector.load %arg5[%c1_54, %c0_55, %c0_56] : memref<9x128x128xbf16, #tpu.memory_space<vmem>>, vector<1x128x128xbf16>
    %69 = vector.shape_cast %68 : vector<1x128x128xbf16> to vector<128x128xbf16>
    %cst_57 = arith.constant dense<0.000000e+00> : vector<64x128xf32>
    %70 = tpu.matmul %67, %69, %cst_57 {dimension_numbers = #tpu.dot_dimension_numbers<[1], [0], [0], [1], [0, 0, 1, 1], [], []>} : vector<64x128xbf16>, vector<128x128xbf16>, vector<64x128xf32> -> vector<64x128xf32>
    %71 = arith.addf %66, %70 : vector<64x128xf32>
    %c2_58 = arith.constant 2 : index
    %c0_59 = arith.constant 0 : index
    %72 = vector.load %arg17[%c2_58, %c0_59] : memref<82x128xbf16, #tpu.memory_space<vmem>>, vector<64x128xbf16>
    %c2_60 = arith.constant 2 : index
    %c0_61 = arith.constant 0 : index
    %c0_62 = arith.constant 0 : index
    %73 = vector.load %arg5[%c2_60, %c0_61, %c0_62] : memref<9x128x128xbf16, #tpu.memory_space<vmem>>, vector<1x128x128xbf16>
    %74 = vector.shape_cast %73 : vector<1x128x128xbf16> to vector<128x128xbf16>
    %cst_63 = arith.constant dense<0.000000e+00> : vector<64x128xf32>
    %75 = tpu.matmul %72, %74, %cst_63 {dimension_numbers = #tpu.dot_dimension_numbers<[1], [0], [0], [1], [0, 0, 1, 1], [], []>} : vector<64x128xbf16>, vector<128x128xbf16>, vector<64x128xf32> -> vector<64x128xf32>
    %76 = vector.broadcast %58 : vector<64x1xf32> to vector<64x128xf32>
    %77 = arith.mulf %75, %76 : vector<64x128xf32>
    %78 = arith.addf %71, %77 : vector<64x128xf32>
    %c8_64 = arith.constant 8 : index
    %c0_65 = arith.constant 0 : index
    %79 = vector.load %arg17[%c8_64, %c0_65] : memref<82x128xbf16, #tpu.memory_space<vmem>>, vector<64x128xbf16>
    %c3_66 = arith.constant 3 : index
    %c0_67 = arith.constant 0 : index
    %c0_68 = arith.constant 0 : index
    %80 = vector.load %arg5[%c3_66, %c0_67, %c0_68] : memref<9x128x128xbf16, #tpu.memory_space<vmem>>, vector<1x128x128xbf16>
    %81 = vector.shape_cast %80 : vector<1x128x128xbf16> to vector<128x128xbf16>
    %cst_69 = arith.constant dense<0.000000e+00> : vector<64x128xf32>
    %82 = tpu.matmul %79, %81, %cst_69 {dimension_numbers = #tpu.dot_dimension_numbers<[1], [0], [0], [1], [0, 0, 1, 1], [], []>} : vector<64x128xbf16>, vector<128x128xbf16>, vector<64x128xf32> -> vector<64x128xf32>
    %83 = vector.broadcast %57 : vector<64x1xf32> to vector<64x128xf32>
    %84 = arith.mulf %82, %83 : vector<64x128xf32>
    %85 = arith.addf %78, %84 : vector<64x128xf32>
    %c9_70 = arith.constant 9 : index
    %c0_71 = arith.constant 0 : index
    %86 = vector.load %arg17[%c9_70, %c0_71] : memref<82x128xbf16, #tpu.memory_space<vmem>>, vector<64x128xbf16>
    %c4 = arith.constant 4 : index
    %c0_72 = arith.constant 0 : index
    %c0_73 = arith.constant 0 : index
    %87 = vector.load %arg5[%c4, %c0_72, %c0_73] : memref<9x128x128xbf16, #tpu.memory_space<vmem>>, vector<1x128x128xbf16>
    %88 = vector.shape_cast %87 : vector<1x128x128xbf16> to vector<128x128xbf16>
    %cst_74 = arith.constant dense<0.000000e+00> : vector<64x128xf32>
    %89 = tpu.matmul %86, %88, %cst_74 {dimension_numbers = #tpu.dot_dimension_numbers<[1], [0], [0], [1], [0, 0, 1, 1], [], []>} : vector<64x128xbf16>, vector<128x128xbf16>, vector<64x128xf32> -> vector<64x128xf32>
    %90 = arith.addf %85, %89 : vector<64x128xf32>
    %c10 = arith.constant 10 : index
    %c0_75 = arith.constant 0 : index
    %91 = vector.load %arg17[%c10, %c0_75] : memref<82x128xbf16, #tpu.memory_space<vmem>>, vector<64x128xbf16>
    %c5 = arith.constant 5 : index
    %c0_76 = arith.constant 0 : index
    %c0_77 = arith.constant 0 : index
    %92 = vector.load %arg5[%c5, %c0_76, %c0_77] : memref<9x128x128xbf16, #tpu.memory_space<vmem>>, vector<1x128x128xbf16>
    %93 = vector.shape_cast %92 : vector<1x128x128xbf16> to vector<128x128xbf16>
    %cst_78 = arith.constant dense<0.000000e+00> : vector<64x128xf32>
    %94 = tpu.matmul %91, %93, %cst_78 {dimension_numbers = #tpu.dot_dimension_numbers<[1], [0], [0], [1], [0, 0, 1, 1], [], []>} : vector<64x128xbf16>, vector<128x128xbf16>, vector<64x128xf32> -> vector<64x128xf32>
    %95 = vector.broadcast %58 : vector<64x1xf32> to vector<64x128xf32>
    %96 = arith.mulf %94, %95 : vector<64x128xf32>
    %97 = arith.addf %90, %96 : vector<64x128xf32>
    %c16 = arith.constant 16 : index
    %c0_79 = arith.constant 0 : index
    %98 = vector.load %arg17[%c16, %c0_79] : memref<82x128xbf16, #tpu.memory_space<vmem>>, vector<64x128xbf16>
    %c6 = arith.constant 6 : index
    %c0_80 = arith.constant 0 : index
    %c0_81 = arith.constant 0 : index
    %99 = vector.load %arg5[%c6, %c0_80, %c0_81] : memref<9x128x128xbf16, #tpu.memory_space<vmem>>, vector<1x128x128xbf16>
    %100 = vector.shape_cast %99 : vector<1x128x128xbf16> to vector<128x128xbf16>
    %cst_82 = arith.constant dense<0.000000e+00> : vector<64x128xf32>
    %101 = tpu.matmul %98, %100, %cst_82 {dimension_numbers = #tpu.dot_dimension_numbers<[1], [0], [0], [1], [0, 0, 1, 1], [], []>} : vector<64x128xbf16>, vector<128x128xbf16>, vector<64x128xf32> -> vector<64x128xf32>
    %102 = vector.broadcast %57 : vector<64x1xf32> to vector<64x128xf32>
    %103 = arith.mulf %101, %102 : vector<64x128xf32>
    %104 = arith.addf %97, %103 : vector<64x128xf32>
    %c17 = arith.constant 17 : index
    %c0_83 = arith.constant 0 : index
    %105 = vector.load %arg17[%c17, %c0_83] : memref<82x128xbf16, #tpu.memory_space<vmem>>, vector<64x128xbf16>
    %c7 = arith.constant 7 : index
    %c0_84 = arith.constant 0 : index
    %c0_85 = arith.constant 0 : index
    %106 = vector.load %arg5[%c7, %c0_84, %c0_85] : memref<9x128x128xbf16, #tpu.memory_space<vmem>>, vector<1x128x128xbf16>
    %107 = vector.shape_cast %106 : vector<1x128x128xbf16> to vector<128x128xbf16>
    %cst_86 = arith.constant dense<0.000000e+00> : vector<64x128xf32>
    %108 = tpu.matmul %105, %107, %cst_86 {dimension_numbers = #tpu.dot_dimension_numbers<[1], [0], [0], [1], [0, 0, 1, 1], [], []>} : vector<64x128xbf16>, vector<128x128xbf16>, vector<64x128xf32> -> vector<64x128xf32>
    %109 = arith.addf %104, %108 : vector<64x128xf32>
    %c18 = arith.constant 18 : index
    %c0_87 = arith.constant 0 : index
    %110 = vector.load %arg17[%c18, %c0_87] : memref<82x128xbf16, #tpu.memory_space<vmem>>, vector<64x128xbf16>
    %c8_88 = arith.constant 8 : index
    %c0_89 = arith.constant 0 : index
    %c0_90 = arith.constant 0 : index
    %111 = vector.load %arg5[%c8_88, %c0_89, %c0_90] : memref<9x128x128xbf16, #tpu.memory_space<vmem>>, vector<1x128x128xbf16>
    %112 = vector.shape_cast %111 : vector<1x128x128xbf16> to vector<128x128xbf16>
    %cst_91 = arith.constant dense<0.000000e+00> : vector<64x128xf32>
    %113 = tpu.matmul %110, %112, %cst_91 {dimension_numbers = #tpu.dot_dimension_numbers<[1], [0], [0], [1], [0, 0, 1, 1], [], []>} : vector<64x128xbf16>, vector<128x128xbf16>, vector<64x128xf32> -> vector<64x128xf32>
    %114 = vector.broadcast %58 : vector<64x1xf32> to vector<64x128xf32>
    %115 = arith.mulf %113, %114 : vector<64x128xf32>
    %116 = arith.addf %109, %115 : vector<64x128xf32>
    %cst_92 = arith.constant dense<0.000000e+00> : vector<128xf32>
    %117 = vector.multi_reduction <add>, %116, %cst_92 [0] : vector<64x128xf32> to vector<128xf32>
    %118 = vector.shape_cast %117 : vector<128xf32> to vector<1x128xf32>
    %119 = arith.mulf %116, %116 : vector<64x128xf32>
    %cst_93 = arith.constant dense<0.000000e+00> : vector<128xf32>
    %120 = vector.multi_reduction <add>, %119, %cst_93 [0] : vector<64x128xf32> to vector<128xf32>
    %121 = vector.shape_cast %120 : vector<128xf32> to vector<1x128xf32>
    %cst_94 = arith.constant dense<0.000000e+00> : vector<1x128xf32>
    %122 = tpu.matmul %118, %0, %cst_94 {dimension_numbers = #tpu.dot_dimension_numbers<[1], [0], [0], [1], [0, 0, 1, 1], [], []>} : vector<1x128xf32>, vector<128x128xf32>, vector<1x128xf32> -> vector<1x128xf32>
    %cst_95 = arith.constant dense<0.000000e+00> : vector<1x128xf32>
    %123 = tpu.matmul %121, %0, %cst_95 {dimension_numbers = #tpu.dot_dimension_numbers<[1], [0], [0], [1], [0, 0, 1, 1], [], []>} : vector<1x128xf32>, vector<128x128xf32>, vector<1x128xf32> -> vector<1x128xf32>
    %124 = arith.mulf %122, %122 : vector<1x128xf32>
    %125 = arith.subf %123, %124 : vector<1x128xf32>
    %cst_96 = arith.constant 9.99999974E-6 : f32
    %126 = vector.broadcast %cst_96 : f32 to vector<1x128xf32>
    %127 = arith.addf %125, %126 : vector<1x128xf32>
    %128 = math.rsqrt %127 : vector<1x128xf32>
    %c0_97 = arith.constant 0 : index
    %c0_98 = arith.constant 0 : index
    %129 = vector.load %arg12[%c0_97, %c0_98] : memref<1x128xf32, #tpu.memory_space<vmem>>, vector<1x128xf32>
    %130 = arith.mulf %128, %129 : vector<1x128xf32>
    %131 = vector.broadcast %122 : vector<1x128xf32> to vector<64x128xf32>
    %132 = arith.subf %116, %131 : vector<64x128xf32>
    %133 = vector.broadcast %130 : vector<1x128xf32> to vector<64x128xf32>
    %134 = arith.mulf %132, %133 : vector<64x128xf32>
    %c0_99 = arith.constant 0 : index
    %c0_100 = arith.constant 0 : index
    %135 = vector.load %arg13[%c0_99, %c0_100] : memref<1x128xf32, #tpu.memory_space<vmem>>, vector<1x128xf32>
    %136 = vector.broadcast %135 : vector<1x128xf32> to vector<64x128xf32>
    %137 = arith.addf %134, %136 : vector<64x128xf32>
    %cst_101 = arith.constant 0.000000e+00 : f32
    %138 = vector.broadcast %cst_101 : f32 to vector<64x128xf32>
    %139 = arith.cmpf oge, %137, %138 : vector<64x128xf32>
    %cst_102 = arith.constant 2.000000e-01 : f32
    %140 = vector.broadcast %cst_102 : f32 to vector<64x128xf32>
    %141 = arith.mulf %140, %137 : vector<64x128xf32>
    %142 = arith.select %139, %137, %141 : vector<64x128xi1>, vector<64x128xf32>
    %c0_103 = arith.constant 0 : index
    %c0_104 = arith.constant 0 : index
    %c0_105 = arith.constant 0 : index
    %143 = vector.load %arg3[%c0_103, %c0_104, %c0_105] : memref<1x64x16xbf16, #tpu.memory_space<vmem>>, vector<1x64x16xbf16>
    %144 = vector.shape_cast %143 : vector<1x64x16xbf16> to vector<64x16xbf16>
    %c0_106 = arith.constant 0 : index
    %c0_107 = arith.constant 0 : index
    %145 = vector.load %arg6[%c0_106, %c0_107] : memref<16x128xbf16, #tpu.memory_space<vmem>>, vector<16x128xbf16>
    %cst_108 = arith.constant dense<0.000000e+00> : vector<64x128xf32>
    %146 = tpu.matmul %144, %145, %cst_108 {dimension_numbers = #tpu.dot_dimension_numbers<[1], [0], [0], [1], [0, 0, 1, 1], [], []>} : vector<64x16xbf16>, vector<16x128xbf16>, vector<64x128xf32> -> vector<64x128xf32>
    %cst_109 = arith.constant dense<0.000000e+00> : vector<128xf32>
    %147 = vector.multi_reduction <add>, %146, %cst_109 [0] : vector<64x128xf32> to vector<128xf32>
    %148 = vector.shape_cast %147 : vector<128xf32> to vector<1x128xf32>
    %149 = arith.mulf %146, %146 : vector<64x128xf32>
    %cst_110 = arith.constant dense<0.000000e+00> : vector<128xf32>
    %150 = vector.multi_reduction <add>, %149, %cst_110 [0] : vector<64x128xf32> to vector<128xf32>
    %151 = vector.shape_cast %150 : vector<128xf32> to vector<1x128xf32>
    %cst_111 = arith.constant dense<0.000000e+00> : vector<1x128xf32>
    %152 = tpu.matmul %148, %0, %cst_111 {dimension_numbers = #tpu.dot_dimension_numbers<[1], [0], [0], [1], [0, 0, 1, 1], [], []>} : vector<1x128xf32>, vector<128x128xf32>, vector<1x128xf32> -> vector<1x128xf32>
    %cst_112 = arith.constant dense<0.000000e+00> : vector<1x128xf32>
    %153 = tpu.matmul %151, %0, %cst_112 {dimension_numbers = #tpu.dot_dimension_numbers<[1], [0], [0], [1], [0, 0, 1, 1], [], []>} : vector<1x128xf32>, vector<128x128xf32>, vector<1x128xf32> -> vector<1x128xf32>
    %154 = arith.mulf %152, %152 : vector<1x128xf32>
    %155 = arith.subf %153, %154 : vector<1x128xf32>
    %cst_113 = arith.constant 9.99999974E-6 : f32
    %156 = vector.broadcast %cst_113 : f32 to vector<1x128xf32>
    %157 = arith.addf %155, %156 : vector<1x128xf32>
    %158 = math.rsqrt %157 : vector<1x128xf32>
    %c0_114 = arith.constant 0 : index
    %c0_115 = arith.constant 0 : index
    %159 = vector.load %arg14[%c0_114, %c0_115] : memref<1x128xf32, #tpu.memory_space<vmem>>, vector<1x128xf32>
    %160 = arith.mulf %158, %159 : vector<1x128xf32>
    %161 = vector.broadcast %152 : vector<1x128xf32> to vector<64x128xf32>
    %162 = arith.subf %146, %161 : vector<64x128xf32>
    %163 = vector.broadcast %160 : vector<1x128xf32> to vector<64x128xf32>
    %164 = arith.mulf %162, %163 : vector<64x128xf32>
    %c0_116 = arith.constant 0 : index
    %c0_117 = arith.constant 0 : index
    %165 = vector.load %arg15[%c0_116, %c0_117] : memref<1x128xf32, #tpu.memory_space<vmem>>, vector<1x128xf32>
    %166 = vector.broadcast %165 : vector<1x128xf32> to vector<64x128xf32>
    %167 = arith.addf %164, %166 : vector<64x128xf32>
    %cst_118 = arith.constant 0.000000e+00 : f32
    %168 = vector.broadcast %cst_118 : f32 to vector<64x128xf32>
    %169 = arith.cmpf oge, %167, %168 : vector<64x128xf32>
    %cst_119 = arith.constant 2.000000e-01 : f32
    %170 = vector.broadcast %cst_119 : f32 to vector<64x128xf32>
    %171 = arith.mulf %170, %167 : vector<64x128xf32>
    %172 = arith.select %169, %167, %171 : vector<64x128xi1>, vector<64x128xf32>
    %173 = arith.addf %142, %172 : vector<64x128xf32>
    %cst_120 = arith.constant 5.000000e-01 : f32
    %174 = vector.broadcast %cst_120 : f32 to vector<64x128xf32>
    %175 = arith.mulf %173, %174 : vector<64x128xf32>
    %c0_121 = arith.constant 0 : index
    %c0_122 = arith.constant 0 : index
    %c0_123 = arith.constant 0 : index
    %176 = vector.load %arg16[%c0_121, %c0_122, %c0_123] : memref<1x64x128xf32, #tpu.memory_space<vmem>>, vector<1x64x128xf32>
    %177 = vector.shape_cast %176 : vector<1x64x128xf32> to vector<64x128xf32>
    %178 = vector.shape_cast %175 : vector<64x128xf32> to vector<1x64x128xf32>
    tpu.vector_store %arg16[%c0_121, %c0_122, %c0_123], %178 {strides = array<i32>} : memref<1x64x128xf32, #tpu.memory_space<vmem>>, vector<1x64x128xf32>,
    return
  }
  func.func @transform_0(%arg0: i32) -> (i32, i32, i32) {
    %c0_i32 = arith.constant 0 : i32
    %c0_i32_0 = arith.constant 0 : i32
    %c0_i32_1 = arith.constant 0 : i32
    return %arg0, %c0_i32, %c0_i32_0 : i32, i32, i32
  }
  func.func @transform_1(%arg0: i32) -> (i32, i32, i32) {
    %c0_i32 = arith.constant 0 : i32
    %c0_i32_0 = arith.constant 0 : i32
    %c0_i32_1 = arith.constant 0 : i32
    return %arg0, %c0_i32, %c0_i32_0 : i32, i32, i32
  }
  func.func @transform_2(%arg0: i32) -> (i32, i32, i32) {
    %c0_i32 = arith.constant 0 : i32
    %c0_i32_0 = arith.constant 0 : i32
    %c0_i32_1 = arith.constant 0 : i32
    return %arg0, %c0_i32, %c0_i32_0 : i32, i32, i32
  }
  func.func @transform_3(%arg0: i32) -> (i32, i32, i32) {
    %c0_i32 = arith.constant 0 : i32
    %c0_i32_0 = arith.constant 0 : i32
    %c0_i32_1 = arith.constant 0 : i32
    %c0_i32_2 = arith.constant 0 : i32
    return %c0_i32, %c0_i32_0, %c0_i32_1 : i32, i32, i32
  }
  func.func @transform_4(%arg0: i32) -> (i32, i32, i32) {
    %c0_i32 = arith.constant 0 : i32
    %c0_i32_0 = arith.constant 0 : i32
    %c0_i32_1 = arith.constant 0 : i32
    %c0_i32_2 = arith.constant 0 : i32
    return %c0_i32, %c0_i32_0, %c0_i32_1 : i32, i32, i32
  }
  func.func @transform_5(%arg0: i32) -> (i32, i32) {
    %c0_i32 = arith.constant 0 : i32
    %c0_i32_0 = arith.constant 0 : i32
    %c0_i32_1 = arith.constant 0 : i32
    return %c0_i32, %c0_i32_0 : i32, i32
  }
  func.func @transform_6(%arg0: i32) -> (i32, i32) {
    %c0_i32 = arith.constant 0 : i32
    %c0_i32_0 = arith.constant 0 : i32
    %c0_i32_1 = arith.constant 0 : i32
    return %c0_i32, %c0_i32_0 : i32, i32
  }
  func.func @transform_7(%arg0: i32) -> (i32, i32) {
    %c0_i32 = arith.constant 0 : i32
    %c0_i32_0 = arith.constant 0 : i32
    %c0_i32_1 = arith.constant 0 : i32
    return %c0_i32, %c0_i32_0 : i32, i32
  }
  func.func @transform_8(%arg0: i32) -> (i32, i32) {
    %c0_i32 = arith.constant 0 : i32
    %c0_i32_0 = arith.constant 0 : i32
    %c0_i32_1 = arith.constant 0 : i32
    return %c0_i32, %c0_i32_0 : i32, i32
  }
  func.func @transform_9(%arg0: i32) -> (i32, i32) {
    %c0_i32 = arith.constant 0 : i32
    %c0_i32_0 = arith.constant 0 : i32
    %c0_i32_1 = arith.constant 0 : i32
    return %c0_i32, %c0_i32_0 : i32, i32
  }
  func.func @transform_10(%arg0: i32) -> (i32, i32) {
    %c0_i32 = arith.constant 0 : i32
    %c0_i32_0 = arith.constant 0 : i32
    %c0_i32_1 = arith.constant 0 : i32
    return %c0_i32, %c0_i32_0 : i32, i32
  }
  func.func @transform_11(%arg0: i32) -> (i32, i32) {
    %c0_i32 = arith.constant 0 : i32
    %c0_i32_0 = arith.constant 0 : i32
    %c0_i32_1 = arith.constant 0 : i32
    return %c0_i32, %c0_i32_0 : i32, i32
  }
  func.func @transform_12(%arg0: i32) -> (i32, i32) {
    %c0_i32 = arith.constant 0 : i32
    %c0_i32_0 = arith.constant 0 : i32
    %c0_i32_1 = arith.constant 0 : i32
    return %c0_i32, %c0_i32_0 : i32, i32
  }
  func.func @transform_13(%arg0: i32) -> (i32, i32) {
    %c0_i32 = arith.constant 0 : i32
    %c0_i32_0 = arith.constant 0 : i32
    %c0_i32_1 = arith.constant 0 : i32
    return %c0_i32, %c0_i32_0 : i32, i32
  }
  func.func @transform_14(%arg0: i32) -> (i32, i32) {
    %c0_i32 = arith.constant 0 : i32
    %c0_i32_0 = arith.constant 0 : i32
    %c0_i32_1 = arith.constant 0 : i32
    return %c0_i32, %c0_i32_0 : i32, i32
  }
  func.func @transform_15(%arg0: i32) -> (i32, i32, i32) {
    %c0_i32 = arith.constant 0 : i32
    %c0_i32_0 = arith.constant 0 : i32
    %c0_i32_1 = arith.constant 0 : i32
    return %arg0, %c0_i32, %c0_i32_0 : i32, i32, i32
  }
}

</mosaic_0001>

<bundles_post_ra>
// kernel: custom-call.2
= control target key start
LH: loop header
LB: loop body
LE: loop exit
PB: predicated region body
PF: predicated region fallthrough
CT: control target
= control target key end

     0   :  { %s6_s0 = inlined_call_operand.vmem [shape: f32[8], index: 0, kind: output, shape index: {}]  }

// kernel: down_block_comp.1
= control target key start
LH: loop header
LB: loop body
LE: loop exit
PB: predicated region body
PF: predicated region fallthrough
CT: control target
= control target key end

     0   :  { %s5087_s18 = smov 0   ;;  %s6401_s0 = inlined_call_operand.vmem [shape: bf16[2,72,16], index: 0, kind: input, shape index: {}]   ;;  %s6402_s1 = inlined_call_operand.vmem [shape: bf16[2,72,16], index: 1, kind: input, shape index: {}]   ;;  %s6403_s2 = inlined_call_operand.vmem [shape: bf16[2,64,16], index: 2, kind: input, shape index: {}]   ;;  %s6404_s3 = inlined_call_operand.vmem [shape: bf16[4,16,128], index: 3, kind: input, shape index: {}]   ;;  %s6405_s4 = inlined_call_operand.vmem [shape: bf16[9,128,128], index: 4, kind: input, shape index: {}]   ;;  %s6406_s5 = inlined_call_operand.vmem [shape: bf16[16,128], index: 5, kind: input, shape index: {}]   ;;  %s6407_s6 = inlined_call_operand.vmem [shape: f32[128,128], index: 6, kind: input, shape index: {}]   ;;  %s6408_s7 = inlined_call_operand.vmem [shape: f32[64,1], index: 7, kind: input, shape index: {}]   ;;  %s6409_s8 = inlined_call_operand.vmem [shape: f32[64,1], index: 8, kind: input, shape index: {}]   ;;  %s6410_s9 = inlined_call_operand.vmem [shape: f32[1,128], index: 9, kind: input, shape index: {}]   ;;  %s6411_s10 = inlined_call_operand.vmem [shape: f32[1,128], index: 10, kind: input, shape index: {}]   ;;  %s6412_s11 = inlined_call_operand.vmem [shape: f32[1,128], index: 11, kind: input, shape index: {}]   ;;  %s6413_s12 = inlined_call_operand.vmem [shape: f32[1,128], index: 12, kind: input, shape index: {}]   ;;  %s6414_s13 = inlined_call_operand.vmem [shape: f32[1,128], index: 13, kind: input, shape index: {}]   ;;  %s6415_s14 = inlined_call_operand.vmem [shape: f32[1,128], index: 14, kind: input, shape index: {}]   ;;  %s6416_s15 = inlined_call_operand.vmem [shape: f32[2,64,128], index: 15, kind: output, shape index: {}]  }
   0x1 LB: > { %s3810_s19 = sadd.s32 4294967295, %s5002_s18   ;;  %p3814_p0 = scmp.ge.s32.totalorder %s5002_s18, 1  ;;  %s5002_s18 = sphi %s5087_s18, %s25_s18  }
   0x2   : > { %p457_p1 = scmp.lt.s32.totalorder %s5002_s18, 3 }
   0x4   : > { %p458_p2 = pnand %p3814_p0, %p457_p1 }
   0x6   : > { %461 = sbr.rel (%p458_p2) target bundleno = 1343 (0x53f), region = 80 }
   0xb   : > { %v4850_v0 = vld [vmem:[%s6404_s3 + $0x8] sm:$0xff]   ;;  %p515_p3 = scmp.lt.s32.totalorder %s3810_s19, 1  ;;  %v4852_v1 = vld [vmem:[%s6404_s3] sm:$0xff]   ;;  %v4856_v2 = vld [vmem:[%s6404_s3 + $0x10] sm:$0xff]   ;;  %vm599_vm0 = vcmask 130048   ;;  %v6417_v20 = vmov 0.0  }
   0xc   : > { %4360 = vmatprep.subr.bf16.mxu1 %v4850_v0  ;;  %4380 = vmatprep.subr.bf16.mxu0 %v4856_v2  ;;  %v4858_v3 = vld [vmem:[%s6404_s3 + $0x18] sm:$0xff]   ;;  %v550_v22 = vld [vmem:[%s6407_s6 + $0x70] sm:$0xff]  ;;  %v549_v23 = vld [vmem:[%s6407_s6 + $0x68] sm:$0xff]  ;;  %vm5005_vm1 = vmmov 0   ;;  %vm1268_vm2 = vcmask 1040384   ;;  %vm1274_vm5 = vcmask 1043456  }
   0xd   : > { %s6526_s19 = smov (!%p515_p3, %s3810_s19), 1  ;;  %4361 = vmatpush3.bf16.msra.mxu1 %v4850_v0  ;;  %4381 = vmatpush3.bf16.msra.mxu0 %v4856_v2  ;;  %v551_v21 = vld [vmem:[%s6407_s6 + $0x78] sm:$0xff]  ;;  %v548_v24 = vld [vmem:[%s6407_s6 + $0x60] sm:$0xff]  ;;  %v546_v26 = vld [vmem:[%s6407_s6 + $0x50] sm:$0xff]  ;;  %vm1269_vm3 = vsmask.f32 256 }
   0xe   : > { %s4836_s26 = smul.u32 36, %s6526_s19  ;;  %4370 = vmatprep.subr.bf16.mxu1 %v4852_v1  ;;  %4400 = vmatprep.subr.mxu0 %v6417_v20  ;;  %v547_v25 = vld [vmem:[%s6407_s6 + $0x58] sm:$0xff]  ;;  %v545_v27 = vld [vmem:[%s6407_s6 + $0x48] sm:$0xff]  ;;  %v544_v28 = vld [vmem:[%s6407_s6 + $0x40] sm:$0xff]  ;;  %vm1275_vm6 = vsmask.f32 7938 }
   0xf   : > { %v543_v29 = vld [vmem:[%s6407_s6 + $0x38] sm:$0xff]  ;;  %v542_v30 = vld [vmem:[%s6407_s6 + $0x30] sm:$0xff]  ;;  %v541_v31 = vld [vmem:[%s6407_s6 + $0x28] sm:$0xff]  ;;  %vm1305_vm8 = vsmask.f32 4368  ;;  %s4116_s20 = sshll.u32 %s6526_s19, 6 }
  0x10   : > { %s5110_s29 = scalar_lea.vmem %s6402_s1, %s4836_s26  ;;  %s519_s21 = scalar_lea.vmem %s6401_s0, %s4836_s26  ;;  %v540_v32 = vld [vmem:[%s6407_s6 + $0x20] sm:$0xff]  ;;  %v539_v33 = vld [vmem:[%s6407_s6 + $0x18] sm:$0xff]  ;;  %v538_v34 = vld [vmem:[%s6407_s6 + $0x10] sm:$0xff] }
  0x11   : > { %v4851_v4 = vld [vmem:[%s5110_s29] sm:$0xff]   ;;  %v4853_v5 = vld [vmem:[%s5110_s29 + $0x8] sm:$0xff]   ;;  %v4854_v6 = vld [vmem:[%s5110_s29 + $0x10] sm:$0xff]   ;;  %s534_s22 = scalar_lea.vmem %s6416_s15, %s4116_s20 }
  0x12   : > { %4362 = vmatprep.mubr.msk.bf16.mxu1 %vm599_vm0, %v4851_v4  ;;  %v4855_v7 = vld [vmem:[%s5110_s29 + $0x18] sm:$0xff]   ;;  %v4860_v8 = vld [vmem:[%s519_s21 + $0x4] sm:$0xff]   ;;  %v4861_v9 = vld [vmem:[%s519_s21 + $0xc] sm:$0xff]  }
  0x13   : > { %4363 = vmatmul.mubr.msk.bf16.vlgmr.msra.gmra.mxu1 %vm599_vm0, %v4853_v5  ;;  %v4857_v10 = vld [vmem:[%s519_s21] sm:$0xff]   ;;  %4382 = vmatprep.mubr.msk.bf16.mxu0 %vm599_vm0, %v4860_v8  ;;  %v4864_v11 = vld [vmem:[%s519_s21 + $0x14] sm:$0xff]   ;;  %v4859_v13 = vld [vmem:[%s519_s21 + $0x8] sm:$0xff]  }
  0x14   : > { %4371 = vmatpush3.bf16.msra.mxu1 %v4852_v1  ;;  %4366 = vmatprep.mubr.msk.bf16.mxu1 %vm599_vm0, %v4854_v6  ;;  %v4865_v12 = vld [vmem:[%s519_s21 + $0x1c] sm:$0xff]   ;;  %v4862_v14 = vld [vmem:[%s519_s21 + $0x10] sm:$0xff]   ;;  %v4866_v16 = vld [vmem:[%s5110_s29 + $0x4] sm:$0xff]  }
  0x15   : > { %4390 = vmatprep.subr.bf16.mxu1 %v4858_v3  ;;  %4383 = vmatmul.mubr.msk.bf16.vlgmr.msra.gmra.mxu0 %vm599_vm0, %v4861_v9  ;;  %v4863_v15 = vld [vmem:[%s519_s21 + $0x18] sm:$0xff]   ;;  %v4867_v17 = vld [vmem:[%s5110_s29 + $0xc] sm:$0xff]   ;;  %v536_v36 = vld [vmem:[%s6407_s6] sm:$0xff]  ;;  %s4115_s21 = sshll.u32 %s6526_s19, 5 }
  0x16   : > { %4386 = vmatprep.mubr.msk.bf16.mxu0 %vm599_vm0, %v4864_v11  ;;  %v4868_v18 = vld [vmem:[%s5110_s29 + $0x14] sm:$0xff]   ;;  %v4869_v19 = vld [vmem:[%s5110_s29 + $0x1c] sm:$0xff]   ;;  %4401 = vmatpush3.msra.mxu0 %v551_v21  ;;  %v537_v35 = vld [vmem:[%s6407_s6 + $0x8] sm:$0xff]  ;;  %s5950_s24 = scalar_lea.vmem %s6403_s2, %s4115_s21 }
  0x17   : > { %4402 = vmatprep.subr.mxu0 %v6417_v20  ;;  %vm5291_vm4 = vmand %vm1268_vm2, %vm1269_vm3 }
  0x18   : > { %4403 = vmatpush3.msra.mxu0 %v550_v22  ;;  %vm5295_vm7 = vmand %vm1274_vm5, %vm1275_vm6  ;;  %vm1682_vm5 = vsmask.f32 7424  ;;  %vm1865_vm6 = vcmask 1046528  }
  0x19   : > { %4404 = vmatprep.subr.mxu0 %v6417_v20  ;;  %vm5413_vm2 = vmor %vm1269_vm3, %vm1305_vm8 }
  0x1a   : > { %4405 = vmatpush3.msra.mxu0 %v549_v23 }
  0x1b   : > { %4367 = vmatmul.mubr.msk.bf16.gmra.mxu1 %vm599_vm0, %v4855_v7  ;;  %4406 = vmatprep.subr.mxu0 %v6417_v20 }
  0x1c   : > { %4372 = vmatprep.mubr.msk.bf16.mxu1 %vm599_vm0, %v4857_v10  ;;  %4407 = vmatpush3.msra.mxu0 %v548_v24 }
  0x1d   : > { %4387 = vmatmul.mubr.msk.bf16.gmra.mxu0 %vm599_vm0, %v4865_v12  ;;  %4408 = vmatprep.subr.mxu0 %v6417_v20 }
  0x1e   : > { %4409 = vmatpush3.msra.mxu0 %v547_v25  ;;  %4432 = vmatprep.mubr.msk.f32.mxu0 %vm5005_vm1, %v6417_v20 }
  0x1f   : > { %4410 = vmatprep.subr.mxu0 %v6417_v20 }
  0x20   : > { %4411 = vmatpush3.msra.mxu0 %v546_v26 }
  0x21   : > { %4412 = vmatprep.subr.mxu0 %v6417_v20 }
  0x22   : > { %4413 = vmatpush3.msra.mxu0 %v545_v27 }
  0x23   : > { %4373 = vmatmul.mubr.msk.bf16.vlgmr.msra.gmra.mxu1 %vm599_vm0, %v4859_v13  ;;  %4414 = vmatprep.subr.mxu0 %v6417_v20 }
  0x24   : > { %4391 = vmatpush3.bf16.msra.mxu1 %v4858_v3  ;;  %4376 = vmatprep.mubr.msk.bf16.mxu1 %vm599_vm0, %v4862_v14 }
  0x25   : > { %4435 = vmatprep.subr.mxu1 %v6417_v20  ;;  %4415 = vmatpush3.msra.mxu0 %v544_v28 }
  0x26   : > { %4416 = vmatprep.subr.mxu0 %v6417_v20 }
  0x27   : > { %4417 = vmatpush3.msra.mxu0 %v543_v29 }
  0x28   : > { %4418 = vmatprep.subr.mxu0 %v6417_v20 }
  0x29   : > { %4419 = vmatpush3.msra.mxu0 %v542_v30 }
  0x2a   : > { %4420 = vmatprep.subr.mxu0 %v6417_v20 }
  0x2b   : > { %4377 = vmatmul.mubr.msk.bf16.gmra.mxu1 %vm599_vm0, %v4863_v15  ;;  %4421 = vmatpush3.msra.mxu0 %v541_v31 }
  0x2c   : > { %4392 = vmatprep.mubr.msk.bf16.mxu1 %vm599_vm0, %v4866_v16  ;;  %4422 = vmatprep.subr.mxu0 %v6417_v20 }
  0x2d   : > { %4423 = vmatpush3.msra.mxu0 %v540_v32 }
  0x2e   : > { %4424 = vmatprep.subr.mxu0 %v6417_v20 }
  0x2f   : > { %4425 = vmatpush3.msra.mxu0 %v539_v33 }
  0x30   : > { %4426 = vmatprep.subr.mxu0 %v6417_v20 }
  0x31   : > { %4427 = vmatpush3.msra.mxu0 %v538_v34 }
  0x32   : > { %4428 = vmatprep.subr.mxu0 %v6417_v20 }
  0x33   : > { %4393 = vmatmul.mubr.msk.bf16.vlgmr.msra.gmra.mxu1 %vm599_vm0, %v4867_v17  ;;  %4429 = vmatpush3.msra.mxu0 %v537_v35 }
  0x34   : > { %4396 = vmatprep.mubr.msk.bf16.mxu1 %vm599_vm0, %v4868_v18  ;;  %4436 = vmatpush3.msra.mxu1 %v551_v21 }
  0x35   : > { %4437 = vmatprep.subr.mxu1 %v6417_v20  ;;  %4430 = vmatprep.subr.mxu0 %v6417_v20 }
  0x36   : > { %4438 = vmatpush3.msra.mxu1 %v550_v22  ;;  %4431 = vmatpush3.msra.mxu0 %v536_v36 }
  0x37   : > { %4439 = vmatprep.subr.mxu1 %v6417_v20 }
  0x38   : > { %4440 = vmatpush3.msra.mxu1 %v549_v23 }
  0x39   : > { %4441 = vmatprep.subr.mxu1 %v6417_v20 }
  0x3a   : > { %4442 = vmatpush3.msra.mxu1 %v548_v24 }
  0x3b   : > { %4397 = vmatmul.mubr.msk.bf16.gmra.mxu1 %vm599_vm0, %v4869_v19  ;;  %4443 = vmatprep.subr.mxu1 %v6417_v20 }
  0x3c   : > { %4444 = vmatpush3.msra.mxu1 %v547_v25  ;;  %4467 = vmatprep.mubr.msk.f32.mxu1 %vm5005_vm1, %v6417_v20 }
  0x3d   : > { %4445 = vmatprep.subr.mxu1 %v6417_v20 }
  0x3e   : > { %4446 = vmatpush3.msra.mxu1 %v546_v26 }
  0x3f   : > { %4447 = vmatprep.subr.mxu1 %v6417_v20 }
  0x40   : > { %4448 = vmatpush3.msra.mxu1 %v545_v27 }
  0x41   : > { %4449 = vmatprep.subr.mxu1 %v6417_v20 }
  0x42   : > { %4450 = vmatpush3.msra.mxu1 %v544_v28 }
  0x43   : > { %4451 = vmatprep.subr.mxu1 %v6417_v20 }
  0x44   : > { %4452 = vmatpush3.msra.mxu1 %v543_v29 }
  0x45   : > { %4453 = vmatprep.subr.mxu1 %v6417_v20 }
  0x46   : > { %4454 = vmatpush3.msra.mxu1 %v542_v30 }
  0x47   : > { %4455 = vmatprep.subr.mxu1 %v6417_v20 }
  0x48   : > { %4456 = vmatpush3.msra.mxu1 %v541_v31 }
  0x49   : > { %4457 = vmatprep.subr.mxu1 %v6417_v20 }
  0x4a   : > { %4458 = vmatpush3.msra.mxu1 %v540_v32 }
  0x4b   : > { %4459 = vmatprep.subr.mxu1 %v6417_v20 }
  0x4c   : > { %4460 = vmatpush3.msra.mxu1 %v539_v33 }
  0x4d   : > { %4461 = vmatprep.subr.mxu1 %v6417_v20 }
  0x4e   : > { %4462 = vmatpush3.msra.mxu1 %v538_v34 }
  0x4f   : > { %4463 = vmatprep.subr.mxu1 %v6417_v20 }
  0x50   : > { %4464 = vmatpush3.msra.mxu1 %v537_v35 }
  0x51   : > { %4465 = vmatprep.subr.mxu1 %v6417_v20 }
  0x52   : > { %4466 = vmatpush3.msra.mxu1 %v536_v36 }
  0xd3   : > { %v4364_v37 = vpop.f32.mrf.mxu1 }
  0xd5   : > { %v646_v38 = vpop.f32.mrf.mxu1  ;;  %v4384_v45 = vpop.f32.mrf.mxu0 }
  0xd7   : > { %v4365_v39 = vpop.f32.mrf.mxu1  ;;  %v863_v48 = vpop.f32.mrf.mxu0 }
  0xd9   : > { %v649_v40 = vpop.f32.mrf.mxu1  ;;  %v4385_v51 = vpop.f32.mrf.mxu0 }
  0xdb   : > { %v4368_v41 = vpop.f32.mrf.mxu1  ;;  %v866_v53 = vpop.f32.mrf.mxu0 }
  0xdd   : > { %v662_v42 = vpop.f32.mrf.mxu1  ;;  %v4388_v56 = vpop.f32.mrf.mxu0 }
  0xdf   : > { %v4369_v43 = vpop.f32.mrf.mxu1  ;;  %v879_v62 = vpop.f32.mrf.mxu0 }
  0xe1   : > { %v665_v44 = vpop.f32.mrf.mxu1  ;;  %v4389_v7 = vpop.f32.mrf.mxu0 }
  0xe3   : > { %v4374_v46 = vpop.f32.mrf.mxu1  ;;  %v882_v22 = vpop.f32.mrf.mxu0 }
  0xe4   : > { %v758_v60 = vadd.f32 %v4374_v46, %v4364_v37 }
  0xe5   : > { %v749_v47 = vpop.f32.mrf.mxu1 }
  0xe6   : > { %v750_v58 = vadd.f32 %v749_v47, %v646_v38  ;;  %v896_v4 = vadd.f32 %v4384_v45, %v758_v60 }
  0xe7   : > { %v4375_v49 = vpop.f32.mrf.mxu1 }
  0xe8   : > { %v761_v0 = vadd.f32 %v4375_v49, %v4365_v39  ;;  %v894_v1 = vadd.f32 %v863_v48, %v750_v58 }
  0xe9   : > { %v752_v50 = vpop.f32.mrf.mxu1 }
  0xea   : > { %v753_v61 = vadd.f32 %v752_v50, %v649_v40  ;;  %v897_v9 = vadd.f32 %v4385_v51, %v761_v0  ;;  %v4870_v0 = vld [vmem:[%s6405_s4 + $0x38] sm:$0xff]  }
  0xeb   : > { %v4378_v52 = vpop.f32.mrf.mxu1  ;;  %4470 = vmatprep.subr.bf16.mxu0 %v4870_v0 }
  0xec   : > { %v895_v5 = vadd.f32 %v866_v53, %v753_v61  ;;  %v774_v12 = vadd.f32 %v4378_v52, %v4368_v41 }
  0xed   : > { %v765_v54 = vpop.f32.mrf.mxu1 }
  0xee   : > { %v766_v2 = vadd.f32 %v765_v54, %v662_v42  ;;  %v900_v28 = vadd.f32 %v4388_v56, %v774_v12  ;;  %v5006_v12 = vmov 0  }
  0xef   : > { %v4379_v55 = vpop.f32.mrf.mxu1  ;;  %1267 = vst [vmem:[#allocation2] sm:$0xf] %v5006_v12  ;;  %1280 = vst [vmem:[#allocation2 + $0x28] sm:$0x1] %v5006_v12  ;;  %4849 = vset.pattern.permute.xlu1 %v5006_v12  ;;  %4848 = vset.pattern.permute.xlu0 %v5006_v12 }
  0xf0   : > { %v898_v13 = vadd.f32 %v879_v62, %v766_v2  ;;  %v777_v21 = vadd.f32 %v4379_v55, %v4369_v43  ;;  %v4872_v2 = vld [vmem:[%s6405_s4 + $0x78] sm:$0xff]  }
  0xf1   : > { %v768_v57 = vpop.f32.mrf.mxu1  ;;  %4494 = vmatprep.subr.bf16.mxu1 %v4872_v2 }
  0xf2   : > { %v769_v14 = vadd.f32 %v768_v57, %v665_v44  ;;  %v901_v34 = vadd.f32 %v4389_v7, %v777_v21  ;;  %v4876_v7 = vld [vmem:[%s6405_s4 + $0x68] sm:$0xff]  }
  0xf3   : > { %v4394_v59 = vpop.f32.mrf.mxu1 }
  0xf4   : > { %v5228_v10 = vadd.f32 %v4394_v59, %v896_v4  ;;  %v899_v30 = vadd.f32 %v882_v22, %v769_v14  ;;  %v4874_v4 = vld [vmem:[%s6405_s4 + $0x70] sm:$0xff]   ;;  %v4880_v22 = vld [vmem:[%s6405_s4 + $0x58] sm:$0xff]  }
  0xf5   : > { %v985_v63 = vpop.f32.mrf.mxu1 }
  0xf6   : > { %v5226_v6 = vadd.f32 %v985_v63, %v894_v1  ;;  %v1039_v24 = vmul.f32 %v5228_v10, %v5228_v10  ;;  %v4871_v1 = vld [vmem:[%s6405_s4 + $0x30] sm:$0xff]  }
  0xf7   : > { %v4395_v3 = vpop.f32.mrf.mxu1 }
  0xf8   : > { %v1037_v16 = vmul.f32 %v5226_v6, %v5226_v6  ;;  %v5234_v17 = vadd.f32 %v4395_v3, %v897_v9  ;;  %v4873_v3 = vld [vmem:[%s6405_s4 + $0x28] sm:$0xff]  }
  0xf9   : > { %v988_v8 = vpop.f32.mrf.mxu1 }
  0xfa   : > { %v5230_v11 = vadd.f32 %v988_v8, %v895_v5  ;;  %v1040_v31 = vmul.f32 %v5234_v17, %v5234_v17  ;;  %v4875_v5 = vld [vmem:[%s6405_s4 + $0x20] sm:$0xff]   ;;  %v4877_v8 = vld [vmem:[%s6405_s4 + $0x18] sm:$0xff]  }
  0xfb   : > { %v4398_v15 = vpop.f32.mrf.mxu1 }
  0xfc   : > { %v1024_v18 = vadd.f32 %v5230_v11, %v5226_v6  ;;  %v1038_v19 = vmul.f32 %v5230_v11, %v5230_v11  ;;  %v5248_v35 = vadd.f32 %v4398_v15, %v900_v28  ;;  %v1277_v15 = vld [vmem:[#allocation2 + $0x24] sm:$0xf]  ;;  %v5327_v28 = vld [vmem:[%s6405_s4 + $0xb8] sm:$0xff]  }
  0xfd   : > { %v1001_v23 = vpop.f32.mrf.mxu1  ;;  %v1278_v21 = vsel %vm5295_vm7, 0, %v1277_v15 }
  0xfe   : > { %v1025_v25 = vadd.f32 %v1024_v18, %v5228_v10  ;;  %v1045_v26 = vadd.f32 %v1038_v19, %v1037_v16  ;;  %v5243_v27 = vadd.f32 %v1001_v23, %v898_v13  ;;  %v1043_v45 = vmul.f32 %v5248_v35, %v5248_v35  ;;  %v1271_v13 = vld [vmem:[#allocation2 + $0x4] sm:$0x1]  ;;  %v4879_v18 = vld [vmem:[%s6405_s4 + $0x10] sm:$0xff]   ;;  %1279 = vst [vmem:[#allocation2 + $0x24] sm:$0xf] %v1278_v21  ;;  %v4881_v23 = vld [vmem:[%s6405_s4 + $0x8] sm:$0xff]  }
  0xff   : > { %v4399_v29 = vpop.f32.mrf.mxu1  ;;  %v4878_v16 = vld [vmem:[%s6405_s4 + $0x60] sm:$0xff]   ;;  %v1272_v19 = vsel %vm5291_vm4, 0, %v1271_v13 }
 0x100   : > { %v1046_v32 = vadd.f32 %v1045_v26, %v1039_v24  ;;  %v1026_v33 = vadd.f32 %v1025_v25, %v5234_v17  ;;  %v1041_v38 = vmul.f32 %v5243_v27, %v5243_v27  ;;  %v5255_v42 = vadd.f32 %v4399_v29, %v901_v34  ;;  %1273 = vst [vmem:[#allocation2 + $0x4] sm:$0x1] %v1272_v19  ;;  %v4882_v24 = vld [vmem:[%s6405_s4 + $0x50] sm:$0xff]   ;;  %v4883_v25 = vld [vmem:[%s6405_s4] sm:$0xff]   ;;  %v4884_v26 = vld [vmem:[%s6405_s4 + $0x48] sm:$0xff]  }
 0x101   : > { %v1004_v36 = vpop.f32.mrf.mxu1  ;;  %v4889_v29 = vld [vmem:[%s6405_s4 + $0x40] sm:$0xff]  }
 0x102   : > { %v1027_v37 = vadd.f32 %v1026_v33, %v5243_v27  ;;  %v1047_v39 = vadd.f32 %v1046_v32, %v1040_v31  ;;  %v5253_v40 = vadd.f32 %v1004_v36, %v899_v30  ;;  %v1044_v48 = vmul.f32 %v5255_v42, %v5255_v42  ;;  %v5336_v30 = vld [vmem:[%s6405_s4 + $0xf8] sm:$0xff]   ;;  %v1402_v31 = vld [vmem:[%s6408_s7 + $0x10] sm:$0xff]  ;;  %v1408_v32 = vld [vmem:[%s6409_s8] sm:$0xff] }
 0x103   : > { %1589 = vperm.xlu1 %4849, %v1402_v31   ;;  %v1403_v33 = vld [vmem:[%s6408_s7 + $0x18] sm:$0xff]  ;;  %v1404_v34 = vld [vmem:[%s6408_s7 + $0x20] sm:$0xff] }
 0x104   : > { %v1048_v41 = vadd.f32 %v1047_v39, %v1041_v38  ;;  %v1028_v43 = vadd.f32 %v1027_v37, %v5253_v40  ;;  %v1042_v44 = vmul.f32 %v5253_v40, %v5253_v40  ;;  %v1400_v36 = vld [vmem:[%s6408_s7] sm:$0xff]  ;;  %v1405_v38 = vld [vmem:[%s6408_s7 + $0x28] sm:$0xff] }
 0x105   : > { %1579 = vperm.xlu0 %4848, %v1400_v36  }
 0x106   : > { %v1029_v46 = vadd.f32 %v1028_v43, %v5248_v35  ;;  %v1049_v47 = vadd.f32 %v1048_v41, %v1042_v44  ;;  %v1401_v41 = vld [vmem:[%s6408_s7 + $0x8] sm:$0xff] }
 0x107   : > { %1994 = vperm.xlu1 %4849, %v1408_v32  }
 0x108   : > { %v1030_v49 = vadd.f32 %v1029_v46, %v5255_v42  ;;  %v1050_v50 = vadd.f32 %v1049_v47, %v1043_v45  ;;  %v1406_v46 = vld [vmem:[%s6408_s7 + $0x30] sm:$0xff] }
 0x109   : > { %1584 = vperm.xlu0 %4848, %v1401_v41  }
 0x10a   : > { %v1031_v51 = vrot.slane %v1030_v49, 4  ;;  %v1051_v52 = vadd.f32 %v1050_v50, %v1044_v48  ;;  %v1407_v50 = vld [vmem:[%s6408_s7 + $0x38] sm:$0xff] }
 0x10b   : > { %1594 = vperm.xlu1 %4849, %v1403_v33  }
 0x10c   : > { %v1032_v53 = vadd.f32 %v1031_v51, %v1030_v49  ;;  %v1052_v54 = vrot.slane %v1051_v52, 4  ;;  %v1204_v49 = vlaneseq }
 0x10e   : > { %v1033_v55 = vrot.slane %v1032_v53, 2  ;;  %v1053_v56 = vadd.f32 %v1052_v54, %v1051_v52  ;;  %v1205_v51 = vshrl.u32 %v1204_v49, 7 }
 0x10f   : > { %1599 = vperm.xlu1 %4849, %v1404_v34   ;;  %v1413_v34 = vld [vmem:[%s6409_s8 + $0x28] sm:$0xff] }
 0x110   : > { %v1034_v57 = vadd.f32 %v1033_v55, %v1032_v53  ;;  %v1054_v58 = vrot.slane %v1053_v56, 2  ;;  %v5366_v52 = vsub.s32 0, %v1205_v51  ;;  %v1409_v53 = vld [vmem:[%s6409_s8 + $0x8] sm:$0xff]  ;;  %v1202_v55 = vld [vmem:[%s6410_s9] sm:$0x1] }
 0x111   : > { %1999 = vperm.xlu0 %4848, %v1409_v53   ;;  %v1387_v53 = vld [vmem:[#allocation2 + $0x4] sm:$0xf] }
 0x112   : > { %v1035_v59 = vrot.slane %v1034_v57, 1  ;;  %v1055_v60 = vadd.f32 %v1054_v58, %v1053_v56  ;;  %6458 = vst [vmem:[#allocation3_spill] sm:$0xff] %v5366_v52  ;;  %v1410_v56 = vld [vmem:[%s6409_s8 + $0x10] sm:$0xff] }
 0x113   : > { %1604 = vperm.xlu1 %4849, %v1405_v38  }
 0x114   : > { %v1036_v61 = vadd.f32 %v1035_v59, %v1034_v57  ;;  %v1056_v62 = vrot.slane %v1055_v60, 1 }
 0x115   : > { %2004 = vperm.xlu0 %4848, %v1410_v56  }
 0x116   : > { %4433 = vmatmul.mubr.f32.vlgmr.msra.gmra.mxu0 %v1036_v61  ;;  %v1057_v63 = vadd.f32 %v1056_v62, %v1055_v60  ;;  %v1411_v60 = vld [vmem:[%s6409_s8 + $0x18] sm:$0xff] }
 0x117   : > { %4471 = vmatpush3.bf16.msra.mxu0 %v4870_v0  ;;  %1609 = vperm.xlu1 %4849, %v1406_v46   ;;  %v1414_v46 = vld [vmem:[%s6409_s8 + $0x30] sm:$0xff] }
 0x118   : > { %4468 = vmatmul.mubr.f32.vlgmr.msra.gmra.mxu1 %v1057_v63  ;;  %4472 = vmatprep.subr.bf16.mxu0 %v4871_v1 }
 0x119   : > { %4495 = vmatpush3.bf16.msra.mxu1 %v4872_v2  ;;  %2009 = vperm.xlu0 %4848, %v1411_v60  }
 0x11a   : > { %4496 = vmatprep.subr.bf16.mxu1 %v4874_v4 }
 0x11b   : > { %4473 = vmatpush3.bf16.msra.mxu0 %v4871_v1  ;;  %1614 = vperm.xlu1 %4849, %v1407_v50  }
 0x11c   : > { %4474 = vmatprep.subr.bf16.mxu0 %v4873_v3 }
 0x11d   : > { %4497 = vmatpush3.bf16.msra.mxu1 %v4874_v4  ;;  %v3863_v4 = vld [vmem:[%s6411_s10] ss:$0 sm:$0xff] }
 0x11e   : > { %4498 = vmatprep.subr.bf16.mxu1 %v4876_v7 }
 0x11f   : > { %4475 = vmatpush3.bf16.msra.mxu0 %v4873_v3 }
 0x120   : > { %4476 = vmatprep.subr.bf16.mxu0 %v4875_v5 }
 0x121   : > { %4499 = vmatpush3.bf16.msra.mxu1 %v4876_v7 }
 0x122   : > { %4500 = vmatprep.subr.bf16.mxu1 %v4878_v16 }
 0x123   : > { %4477 = vmatpush3.bf16.msra.mxu0 %v4875_v5 }
 0x124   : > { %4478 = vmatprep.subr.bf16.mxu0 %v4877_v8 }
 0x125   : > { %4501 = vmatpush3.bf16.msra.mxu1 %v4878_v16 }
 0x126   : > { %4502 = vmatprep.subr.bf16.mxu1 %v4880_v22 }
 0x127   : > { %4479 = vmatpush3.bf16.msra.mxu0 %v4877_v8 }
 0x128   : > { %4480 = vmatprep.subr.bf16.mxu0 %v4879_v18 }
 0x129   : > { %4503 = vmatpush3.bf16.msra.mxu1 %v4880_v22 }
 0x12a   : > { %4504 = vmatprep.subr.bf16.mxu1 %v4882_v24 }
 0x12b   : > { %4481 = vmatpush3.bf16.msra.mxu0 %v4879_v18 }
 0x12c   : > { %4482 = vmatprep.subr.bf16.mxu0 %v4881_v23 }
 0x12d   : > { %4505 = vmatpush3.bf16.msra.mxu1 %v4882_v24 }
 0x12e   : > { %4506 = vmatprep.subr.bf16.mxu1 %v4884_v26 }
 0x12f   : > { %4483 = vmatpush3.bf16.msra.mxu0 %v4881_v23 }
 0x130   : > { %4484 = vmatprep.subr.bf16.mxu0 %v4883_v25 }
 0x131   : > { %4507 = vmatpush3.bf16.msra.mxu1 %v4884_v26 }
 0x132   : > { %4508 = vmatprep.subr.bf16.mxu1 %v4889_v29 }
 0x133   : > { %4485 = vmatpush3.bf16.msra.mxu0 %v4883_v25 }
 0x134   : > { %4518 = vmatprep.subr.bf16.mxu0 %v5327_v28 }
 0x135   : > { %4509 = vmatpush3.bf16.msra.mxu1 %v4889_v29 }
 0x136   : > { %4542 = vmatprep.subr.bf16.mxu1 %v5336_v30 }
 0x1d6   : > { %v1124_v37 = vpop.f32.mrf.mxu0 }
 0x1d7   : > { %v1198_v39 = vmul.f32 %v1124_v37, %v1124_v37  ;;  %v1207_v54 = vrot.slane %v1124_v37, %v5366_v52 }
 0x1d8   : > { %v4434_v43 = vpop.f32.mrf.mxu0  ;;  %v1194_v44 = vpop.f32.mrf.mxu1 }
 0x1d9   : > { %v1199_v47 = vsub.f32 %v1194_v44, %v1198_v39  ;;  %v1208_v59 = vsub.f32 %v5226_v6, %v1207_v54  ;;  %v1209_v61 = vsub.f32 %v5230_v11, %v1207_v54  ;;  %v1210_v62 = vsub.f32 %v5228_v10, %v1207_v54 }
 0x1da   : > { %v4469_v45 = vpop.f32.mrf.mxu1  ;;  %v1211_v63 = vsub.f32 %v5234_v17, %v1207_v54  ;;  %v1212_v1 = vsub.f32 %v5243_v27, %v1207_v54  ;;  %v1213_v2 = vsub.f32 %v5253_v40, %v1207_v54  ;;  %v1214_v3 = vsub.f32 %v5248_v35, %v1207_v54  ;;  %v1412_v27 = vld [vmem:[%s6409_s8 + $0x20] sm:$0xff] }
 0x1db   : > { %v1200_v48 = vadd.f32 1e-05, %v1199_v47  ;;  %v1215_v6 = vsub.f32 %v5255_v42, %v1207_v54  ;;  %2014 = vperm.xlu0 %4848, %v1412_v27  }
 0x1dd   : > { %4974 = vrsqrt.f32 %v1200_v48 }
 0x1df   : > { %2019 = vperm.xlu0 %4848, %v1413_v34  }
 0x1e3   : > { %2024 = vperm.xlu0 %4848, %v1414_v46  }
 0x1ea   : > { %v4975_v57 = vpop.eup %4974 }
 0x1eb   : > { %v1203_v58 = vmul.f32 %v4975_v57, %v1202_v55 }
 0x1ed   : > { %v1219_v0 = vrot.slane %v1203_v58, %v5366_v52 }
 0x1ef   : > { %v1220_v11 = vmul.f32 %v1219_v0, %v1208_v59  ;;  %v1221_v5 = vmul.f32 %v1219_v0, %v1209_v61  ;;  %v1222_v10 = vmul.f32 %v1219_v0, %v1210_v62  ;;  %v1223_v7 = vmul.f32 %v1219_v0, %v1211_v63 }
 0x1f0   : > { %v1224_v17 = vmul.f32 %v1219_v0, %v1212_v1  ;;  %v1225_v8 = vmul.f32 %v1219_v0, %v1213_v2  ;;  %v1226_v12 = vmul.f32 %v1219_v0, %v1214_v3  ;;  %v1227_v13 = vmul.f32 %v1219_v0, %v1215_v6  ;;  %v1415_v2 = vld [vmem:[%s6409_s8 + $0x38] sm:$0xff] }
 0x1f1   : > { %v1235_v40 = vadd.f32 %v3863_v4, %v1220_v11  ;;  %v1236_v35 = vadd.f32 %v3863_v4, %v1221_v5  ;;  %v1237_v15 = vadd.f32 %v3863_v4, %v1222_v10  ;;  %v1238_v42 = vadd.f32 %v3863_v4, %v1223_v7  ;;  %2029 = vperm.xlu1 %4849, %v1415_v2  }
 0x1f2   : > { %v5396_v16 = vadd.f32 %v3863_v4, %v1227_v13  ;;  %v1239_v18 = vadd.f32 %v3863_v4, %v1224_v17  ;;  %v5398_v19 = vadd.f32 %v3863_v4, %v1225_v8  ;;  %v5400_v21 = vadd.f32 %v3863_v4, %v1226_v12 }
 0x1f3   : > { %vm1243_vm9 = vcmp.ge.f32.partialorder %v1235_v40, 0.0  ;;  %v1251_v22 = vmul.f32 0.2, %v1235_v40  ;;  %vm1244_vm10 = vcmp.ge.f32.partialorder %v1236_v35, 0.0  ;;  %vm1245_vm11 = vcmp.ge.f32.partialorder %v1237_v15, 0.0 }
 0x1f4   : > { %v1252_v23 = vmul.f32 0.2, %v1236_v35  ;;  %v1253_v24 = vmul.f32 0.2, %v1237_v15  ;;  %vm1246_vm12 = vcmp.ge.f32.partialorder %v1238_v42, 0.0  ;;  %vm1247_vm13 = vcmp.ge.f32.partialorder %v1239_v18, 0.0 }
 0x1f5   : > { %v1259_v25 = vsel %vm1243_vm9, %v1235_v40, %v1251_v22  ;;  %v1254_v26 = vmul.f32 0.2, %v1238_v42  ;;  %v1255_v29 = vmul.f32 0.2, %v1239_v18  ;;  %vm1248_vm14 = vcmp.ge.f32.partialorder %v5398_v19, 0.0 }
 0x1f6   : > { %v4117_v31 = vpack.c.bf16 %v1259_v25, %v1259_v25  ;;  %v1260_v32 = vsel %vm1244_vm10, %v1236_v35, %v1252_v23  ;;  %v1261_v33 = vsel %vm1245_vm11, %v1237_v15, %v1253_v24  ;;  %vm1249_vm15 = vcmp.ge.f32.partialorder %v5400_v21, 0.0  ;;  %v1633_v24 = vld [vmem:[#allocation2] sm:$0xf] }
 0x1f7   : > { %v4118_v36 = vpack.c.bf16 %v1260_v32, %v1260_v32  ;;  %v4119_v37 = vpack.c.bf16 %v1261_v33, %v1261_v33  ;;  %v1262_v38 = vsel %vm1246_vm12, %v1238_v42, %v1254_v26  ;;  %v1263_v39 = vsel %vm1247_vm13, %v1239_v18, %v1255_v29  ;;  %v4890_v32 = vld [vmem:[%s6405_s4 + $0xb0] sm:$0xff]  }
 0x1f8   : > { %v1308_v41 = vshrl.u32 %v4117_v31, 16  ;;  %v1311_v43 = vshll.u32 %v4117_v31, 16  ;;  %v4120_v44 = vpack.c.bf16 %v1262_v38, %v1262_v38  ;;  %v4121_v45 = vpack.c.bf16 %v1263_v39, %v1263_v39 }
 0x1f9   : > { %v1316_v47 = vshrl.u32 %v4118_v36, 16  ;;  %v1319_v48 = vshll.u32 %v4118_v36, 16  ;;  %v1325_v49 = vshrl.u32 %v4119_v37, 16  ;;  %v1328_v50 = vshll.u32 %v4119_v37, 16 }
 0x1fa   : > { %v1310_v51 = vrot.slane %v1308_v41, 7  ;;  %v1334_v54 = vshrl.u32 %v4120_v44, 16  ;;  %v1337_v55 = vshll.u32 %v4120_v44, 16  ;;  %v1343_v56 = vshrl.u32 %v4121_v45, 16 }
 0x1fb   : > { %v1318_v57 = vrot.slane %v1316_v47, 7  ;;  %v1327_v58 = vrot.slane %v1325_v49, 7  ;;  %v1346_v59 = vshll.u32 %v4121_v45, 16  ;;  %v1256_v60 = vmul.f32 0.2, %v5398_v19 }
 0x1fc   : > { %v1313_v62 = vor.u32 %v1311_v43, %v1310_v51  ;;  %v1314_v63 = vrot.slane %v1310_v51, 4  ;;  %v1336_v0 = vrot.slane %v1334_v54, 7  ;;  %v1345_v1 = vrot.slane %v1343_v56, 7 }
 0x1fd   : > { %v1321_v3 = vor.u32 %v1319_v48, %v1318_v57  ;;  %v1323_v6 = vrot.slane %v1318_v57, 4  ;;  %v1330_v4 = vor.u32 %v1328_v50, %v1327_v58  ;;  %v1332_v11 = vrot.slane %v1327_v58, 4 }
 0x1fe   : > { %v1388_v5 = vsel %vm5295_vm7, %v1313_v62, %v1387_v53  ;;  %v1339_v10 = vor.u32 %v1337_v55, %v1336_v0  ;;  %v1341_v7 = vrot.slane %v1336_v0, 4  ;;  %v1348_v17 = vor.u32 %v1346_v59, %v1345_v1 }
 0x1ff   : > { %1389 = vst [vmem:[#allocation2 + $0x4] sm:$0xf] %v1388_v5  ;;  %v1322_v8 = vsel %vm5413_vm2, %v1314_v63, %v1321_v3  ;;  %v1331_v12 = vsel %vm5413_vm2, %v1323_v6, %v1330_v4  ;;  %v1257_v13 = vmul.f32 0.2, %v5400_v21  ;;  %v1264_v27 = vsel %vm1248_vm14, %v5398_v19, %v1256_v60  ;;  %v4900_v5 = vld [vmem:[%s6405_s4 + $0xa0] sm:$0xff]  }
 0x200   : > { %1390 = vst [vmem:[#allocation2 + $0x8] sm:$0xf] %v1322_v8  ;;  %1391 = vst [vmem:[#allocation2 + $0xc] sm:$0xf] %v1331_v12  ;;  %v1340_v14 = vsel %vm5413_vm2, %v1332_v11, %v1339_v10  ;;  %v1349_v40 = vsel %vm5413_vm2, %v1341_v7, %v1348_v17  ;;  %v4122_v35 = vpack.c.bf16 %v1264_v27, %v1264_v27  ;;  %vm1250_vm3 = vcmp.ge.f32.partialorder %v5396_v16, 0.0  ;;  %v4899_v8 = vld [vmem:[%s6405_s4 + $0xf0] sm:$0xff]  }
 0x201   : > { %1392 = vst [vmem:[#allocation2 + $0x10] sm:$0xf] %v1340_v14  ;;  %1393 = vst [vmem:[#allocation2 + $0x14] sm:$0xf] %v1349_v40  ;;  %v1265_v15 = vsel %vm1249_vm15, %v5400_v21, %v1257_v13  ;;  %v1258_v42 = vmul.f32 0.2, %v5396_v16 }
 0x202   : > { %v4123_v18 = vpack.c.bf16 %v1265_v15, %v1265_v15  ;;  %v1352_v19 = vshrl.u32 %v4122_v35, 16  ;;  %v1350_v22 = vrot.slane %v1345_v1, 4  ;;  %v1355_v26 = vshll.u32 %v4122_v35, 16  ;;  %v1844_v21 = vld [vmem:[#allocation2] sm:$0xe]  ;;  %v4903_v14 = vld [vmem:[%s6405_s4 + $0x98] sm:$0xff]  }
 0x203   : > { %v1266_v23 = vsel %vm1250_vm3, %v5396_v16, %v1258_v42 }
 0x204   : > { %v1354_v25 = vrot.slane %v1352_v19, 7  ;;  %v1361_v29 = vshrl.u32 %v4123_v18, 16  ;;  %v4124_v31 = vpack.c.bf16 %v1266_v23, %v1266_v23  ;;  %v1364_v33 = vshll.u32 %v4123_v18, 16  ;;  %v4901_v19 = vld [vmem:[%s6405_s4 + $0xe8] sm:$0xff]  }
 0x206   : > { %v4885_v34 = vld [vmem:[#allocation2] sm:$0xff]   ;;  %v1357_v37 = vor.u32 %v1355_v26, %v1354_v25  ;;  %v1359_v38 = vrot.slane %v1354_v25, 4  ;;  %v1363_v16 = vrot.slane %v1361_v29, 7  ;;  %v1370_v45 = vshrl.u32 %v4124_v31, 16  ;;  %v4906_v25 = vld [vmem:[%s6405_s4 + $0x90] sm:$0xff]  }
 0x207   : > { %v5443_v36 = vld [vmem:[#allocation2 + $0x4] sm:$0xf]  ;;  %v4887_v39 = vld [vmem:[#allocation2 + $0x8] sm:$0xff]   ;;  %4486 = vmatprep.mubr.bf16.mxu0 %v4885_v34  ;;  %v1373_v63 = vshll.u32 %v4124_v31, 16 }
 0x208   : > { %v3900_v41 = vcombine.low %v1633_v24, %v5443_v36  ;;  %v4888_v43 = vld [vmem:[#allocation2 + $0x10] sm:$0xff]   ;;  %v1358_v44 = vsel %vm5413_vm2, %v1350_v22, %v1357_v37  ;;  %4487 = vmatmul.mubr.bf16.vlgmr.msra.gmra.mxu0 %v4887_v39  ;;  %v5448_v46 = vld [vmem:[#allocation2 + $0x8] sm:$0xf]  ;;  %v5450_v47 = vld [vmem:[#allocation2 + $0xc] sm:$0xf]  ;;  %v1366_v49 = vor.u32 %v1364_v33, %v1363_v16  ;;  %v3929_v55 = vcombine.low %v1844_v21, %v5443_v36 }
 0x209   : > { %1394 = vst [vmem:[#allocation2 + $0x18] sm:$0xf] %v1358_v44  ;;  %4519 = vmatpush3.bf16.msra.mxu0 %v5327_v28  ;;  %4490 = vmatprep.mubr.bf16.mxu0 %v4888_v43  ;;  %v5455_v50 = vcombine.low %v5448_v46, %v5450_v47  ;;  %v5457_v53 = vld [vmem:[#allocation2 + $0x10] sm:$0xf]  ;;  %v5459_v54 = vld [vmem:[#allocation2 + $0x14] sm:$0xf] }
 0x20a   : > { %v1686_v48 = vshll.u32 %v3900_v41, 16  ;;  %v1684_v51 = vshrl.u32 %v3900_v41, 16  ;;  %4520 = vmatprep.subr.bf16.mxu0 %v4890_v32  ;;  %v5464_v57 = vcombine.low %v5457_v53, %v5459_v54  ;;  %v4895_v28 = vld [vmem:[%s6405_s4 + $0xa8] sm:$0xff]   ;;  %v1367_v58 = vsel %vm5413_vm2, %v1359_v38, %v1366_v49  ;;  %v1397_v22 = vld [vmem:[#allocation2 + $0x24] sm:$0x1]  ;;  %v4907_v38 = vld [vmem:[%s6405_s4 + $0xd8] sm:$0xff]  }
 0x20b   : > { %v1372_v59 = vrot.slane %v1370_v45, 7  ;;  %v1691_v60 = vshll.u32 %v5455_v50, 16  ;;  %1395 = vst [vmem:[#allocation2 + $0x1c] sm:$0xf] %v1367_v58  ;;  %v1368_v62 = vrot.slane %v1363_v16, 4  ;;  %v1695_v3 = vshrl.u32 %v5455_v50, 16 }
 0x20c   : > { %v1688_v56 = vrot.slane %v1686_v48, 1  ;;  %v1699_v1 = vshll.u32 %v5464_v57, 16  ;;  %v1866_v4 = vrot.slane %v3929_v55, 1  ;;  %v1867_v11 = vrot.slane %v5455_v50, 1  ;;  %v4908_v37 = vld [vmem:[%s6405_s4 + $0x88] sm:$0xff]   ;;  %v4910_v44 = vld [vmem:[%s6405_s4 + $0x80] sm:$0xff]  }
 0x20d   : > { %4521 = vmatpush3.bf16.msra.mxu0 %v4890_v32  ;;  %v1693_v2 = vrot.slane %v1691_v60, 1  ;;  %v1375_v6 = vor.u32 %v1373_v63, %v1372_v59  ;;  %v1703_v15 = vshrl.u32 %v5464_v57, 16  ;;  %v1377_v42 = vrot.slane %v1372_v59, 4  ;;  %v4905_v32 = vld [vmem:[%s6405_s4 + $0xe0] sm:$0xff]   ;;  %v5527_v43 = vld [vmem:[#allocation2 + $0x8] sm:$0xf] }
 0x20e   : > { %v1689_v0 = vor.u32 %v1688_v56, %v1684_v51  ;;  %4522 = vmatprep.subr.bf16.mxu0 %v4895_v28  ;;  %v1701_v17 = vrot.slane %v1699_v1, 1  ;;  %v1868_v18 = vsel %vm1865_vm6, %v1866_v4, %v1867_v11  ;;  %v3954_v41 = vcombine.low %v5443_v36, %v5448_v46  ;;  %v2205_v16 = vld [vmem:[#allocation2 + $0x4] sm:$0xf]  ;;  %v4909_v45 = vld [vmem:[%s6405_s4 + $0xd0] sm:$0xff]   ;;  %v4912_v36 = vld [vmem:[%s6405_s4 + $0x138] sm:$0xff]  }
 0x20f   : > { %v1697_v7 = vor.u32 %v1695_v3, %v1693_v2  ;;  %v1376_v12 = vsel %vm5413_vm2, %v1368_v62, %v1375_v6  ;;  %v1398_v31 = vsel %vm5291_vm4, %v1377_v42, %v1397_v22  ;;  %v3982_v48 = vcombine.low %v2205_v16, %v5527_v43  ;;  %v5540_v49 = vld [vmem:[#allocation2 + $0xc] sm:$0xf]  ;;  %v5542_v51 = vld [vmem:[#allocation2 + $0x10] sm:$0xf]  ;;  %v4913_v62 = vld [vmem:[%s6405_s4 + $0xc0] sm:$0xff]  }
 0x210   : > { %v1694_v10 = vsel %vm1682_vm5, %v1689_v0, %v1693_v2  ;;  %v5484_v13 = vld [vmem:[#allocation2 + $0x18] sm:$0xf]  ;;  %1396 = vst [vmem:[#allocation2 + $0x20] sm:$0xf] %v1376_v12  ;;  %v1705_v23 = vor.u32 %v1703_v15, %v1701_v17  ;;  %1399 = vst [vmem:[#allocation2 + $0x24] sm:$0x1] %v1398_v31 }
 0x211   : > { %4510 = vmatprep.mubr.bf16.mxu1 %v1694_v10  ;;  %v1702_v27 = vsel %vm1682_vm5, %v1697_v7, %v1701_v17  ;;  %4523 = vmatpush3.bf16.msra.mxu0 %v4895_v28  ;;  %v1869_v46 = vrot.slane %v5464_v57, 1  ;;  %v4911_v55 = vld [vmem:[%s6405_s4 + $0xc8] sm:$0xff]   ;;  %v2257_v28 = vshll.u32 %v3982_v48, 16  ;;  %v4914_v58 = vld [vmem:[%s6405_s4 + $0x130] sm:$0xff]   ;;  %v5553_v57 = vcombine.low %v5540_v49, %v5542_v51  ;;  %v4916_v3 = vld [vmem:[%s6405_s4 + $0x178] sm:$0xff]  }
 0x212   : > { %4511 = vmatmul.mubr.bf16.vlgmr.msra.gmra.mxu1 %v1702_v27  ;;  %v4896_v40 = vld [vmem:[#allocation2 + $0x18] sm:$0xff]   ;;  %4524 = vmatprep.subr.bf16.mxu0 %v4900_v5  ;;  %v4917_v0 = vld [vmem:[%s6405_s4 + $0x128] sm:$0xff]   ;;  %v2255_v1 = vshrl.u32 %v3982_v48, 16  ;;  %v2415_v10 = vld [vmem:[#allocation2 + $0x4] sm:$0xe]  ;;  %v3955_v7 = vcombine.low %v5450_v47, %v5457_v53  ;;  %v3956_v12 = vcombine.low %v5459_v54, %v5484_v13 }
 0x213   : > { %v5490_v35 = vld [vmem:[#allocation2 + $0x1c] sm:$0xf]  ;;  %4543 = vmatpush3.bf16.msra.mxu1 %v5336_v30  ;;  %4491 = vmatmul.mubr.bf16.gmra.mxu0 %v4896_v40  ;;  %v1870_v59 = vsel %vm1865_vm6, %v1867_v11, %v1869_v46  ;;  %v2259_v63 = vrot.slane %v2257_v28, 1  ;;  %v2262_v50 = vshll.u32 %v5553_v57, 16  ;;  %v4921_v11 = vld [vmem:[%s6405_s4 + $0x120] sm:$0xff]   ;;  %v4011_v47 = vcombine.low %v2415_v10, %v5527_v43  ;;  %v4922_v53 = vld [vmem:[%s6405_s4 + $0x168] sm:$0xff]  }
 0x214   : > { %v5495_v61 = vcombine.low %v5484_v13, %v5490_v35  ;;  %4544 = vmatprep.subr.bf16.mxu1 %v4899_v8  ;;  %4534 = vmatprep.mubr.bf16.mxu0 %v1868_v18  ;;  %v4923_v27 = vld [vmem:[%s6405_s4 + $0x118] sm:$0xff]   ;;  %v5589_v54 = vld [vmem:[#allocation2 + $0x14] sm:$0xf]  ;;  %v4925_v18 = vld [vmem:[%s6405_s4 + $0x160] sm:$0xff]  }
 0x215   : > { %4525 = vmatpush3.bf16.msra.mxu0 %v4900_v5  ;;  %v2260_v6 = vor.u32 %v2259_v63, %v2255_v1  ;;  %v2264_v4 = vrot.slane %v2262_v50, 1  ;;  %v5591_v13 = vld [vmem:[#allocation2 + $0x18] sm:$0xf]  ;;  %v2436_v40 = vrot.slane %v4011_v47, 1  ;;  %v4926_v15 = vld [vmem:[%s6405_s4 + $0x110] sm:$0xff]   ;;  %v4942_v50 = vld [vmem:[%s6405_s4 + $0x1a0] sm:$0xff]  }
 0x216   : > { %v1707_v30 = vshll.u32 %v5495_v61, 16  ;;  %v1711_v24 = vshrl.u32 %v5495_v61, 16  ;;  %4526 = vmatprep.subr.bf16.mxu0 %v4903_v14  ;;  %v1871_v56 = vrot.slane %v5495_v61, 1  ;;  %v2437_v61 = vrot.slane %v5553_v57, 1  ;;  %v4929_v31 = vld [vmem:[%s6405_s4 + $0x150] sm:$0xff]  }
 0x217   : > { %4545 = vmatpush3.bf16.msra.mxu1 %v4899_v8  ;;  %v5509_v29 = vld [vmem:[#allocation2 + $0x20] ss:$0 sps:$4 sm:$0x11]   ;;  %v2265_v17 = vsel %vm1682_vm5, %v2260_v6, %v2264_v4  ;;  %v4920_v8 = vld [vmem:[%s6405_s4 + $0x170] sm:$0xff]   ;;  %v2735_v48 = vld [vmem:[#allocation2 + $0x8] sm:$0xf]  ;;  %v4036_v6 = vcombine.low %v5527_v43, %v5540_v49 }
 0x218   : > { %v1709_v26 = vrot.slane %v1707_v30, 1  ;;  %4546 = vmatprep.subr.bf16.mxu1 %v4901_v19  ;;  %v1715_v34 = vshll.u32 %v5509_v29, 16  ;;  %v1872_v60 = vsel %vm1865_vm6, %v1869_v46, %v1871_v56  ;;  %v1873_v2 = vrot.slane %v5509_v29, 1  ;;  %v5613_v30 = vld [vmem:[#allocation2 + $0x20] sm:$0xf]  ;;  %v4944_v43 = vld [vmem:[%s6405_s4 + $0x198] sm:$0xff]  }
 0x219   : > { %4527 = vmatpush3.bf16.msra.mxu0 %v4903_v14  ;;  %v2048_v14 = vld [vmem:[#allocation2 + $0x20] sm:$0xf]  ;;  %v2438_v22 = vsel %vm1865_vm6, %v2436_v40, %v2437_v61 }
 0x21a   : > { %v1710_v33 = vsel %vm1682_vm5, %v1705_v23, %v1709_v26  ;;  %v1713_v21 = vor.u32 %v1711_v24, %v1709_v26  ;;  %4528 = vmatprep.subr.bf16.mxu0 %v4906_v25  ;;  %v1717_v9 = vrot.slane %v1715_v34, 1  ;;  %v1874_v5 = vsel %vm1865_vm6, %v1871_v56, %v1873_v2  ;;  %v5611_v23 = vld [vmem:[#allocation2 + $0x1c] sm:$0xf]  ;;  %v4930_v26 = vld [vmem:[%s6405_s4 + $0x100] sm:$0xff]  }
 0x21b   : > { %4514 = vmatprep.mubr.bf16.mxu1 %v1710_v33  ;;  %4547 = vmatpush3.bf16.msra.mxu1 %v4901_v19  ;;  %v3957_v42 = vcombine.low %v5490_v35, %v2048_v14  ;;  %v5603_v19 = vcombine.low %v5589_v54, %v5591_v13  ;;  %v4928_v35 = vld [vmem:[%s6405_s4 + $0x108] sm:$0xff]   ;;  %v4927_v24 = vld [vmem:[%s6405_s4 + $0x158] sm:$0xff]   ;;  %v5624_v29 = vcombine.low %v5611_v23, %v5613_v30  ;;  %v2266_v33 = vshrl.u32 %v5553_v57, 16 }
 0x21c   : > { %4548 = vmatprep.subr.bf16.mxu1 %v4905_v32  ;;  %v1718_v39 = vsel %vm1682_vm5, %v1713_v21, %v1717_v9  ;;  %v4933_v21 = vld [vmem:[%s6405_s4 + $0x1b8] sm:$0xff]   ;;  %v4943_v57 = vld [vmem:[%s6405_s4 + $0x1e8] sm:$0xff]  }
 0x21d   : > { %4529 = vmatpush3.bf16.msra.mxu0 %v4906_v25  ;;  %4515 = vmatmul.mubr.bf16.gmra.mxu1 %v1718_v39  ;;  %v2270_v25 = vshll.u32 %v5603_v19, 16  ;;  %v2274_v34 = vshrl.u32 %v5603_v19, 16  ;;  %v2268_v9 = vor.u32 %v2266_v33, %v2264_v4  ;;  %v2282_v56 = vshrl.u32 %v5624_v29, 16  ;;  %v4941_v4 = vld [vmem:[%s6405_s4 + $0x1f0] sm:$0xff]   ;;  %v5719_v33 = vld [vmem:[#allocation2 + $0x20] sm:$0xff]  }
 0x21e   : > { %4530 = vmatprep.subr.bf16.mxu0 %v4908_v37  ;;  %4558 = vmatprep.mubr.bf16.mxu1 %v3954_v41  ;;  %v4938_v41 = vld [vmem:[#allocation2 + $0x24] ss:$0 sps:$4 sm:$0x11]   ;;  %v2439_v63 = vrot.slane %v5603_v19, 1  ;;  %v2441_v1 = vrot.slane %v5624_v29, 1  ;;  %v4955_v19 = vld [vmem:[%s6405_s4 + $0x238] sm:$0xff]  }
 0x21f   : > { %4549 = vmatpush3.bf16.msra.mxu1 %v4905_v32  ;;  %v2272_v32 = vrot.slane %v2270_v25, 1  ;;  %v2286_v28 = vshll.u32 %v4938_v41, 16  ;;  %v4037_v25 = vcombine.low %v5542_v51, %v5589_v54 }
 0x220   : > { %4550 = vmatprep.subr.bf16.mxu1 %v4907_v38  ;;  %v2442_v10 = vsel %vm1865_vm6, %v2439_v63, %v2441_v1 }
 0x221   : > { %4531 = vmatpush3.bf16.msra.mxu0 %v4908_v37  ;;  %v2278_v37 = vshll.u32 %v5624_v29, 16  ;;  %v2276_v39 = vor.u32 %v2274_v34, %v2272_v32 }
 0x222   : > { %4532 = vmatprep.subr.bf16.mxu0 %v4910_v44 }
 0x223   : > { %4551 = vmatpush3.bf16.msra.mxu1 %v4907_v38  ;;  %v4931_v38 = vld [vmem:[%s6405_s4 + $0x148] sm:$0xff]   ;;  %v2280_v16 = vrot.slane %v2278_v37, 1  ;;  %v2808_v37 = vshll.u32 %v5719_v33, 16 }
 0x224   : > { %4552 = vmatprep.subr.bf16.mxu1 %v4909_v45 }
 0x225   : > { %4533 = vmatpush3.bf16.msra.mxu0 %v4910_v44  ;;  %v4936_v44 = vld [vmem:[%s6405_s4 + $0x1b0] sm:$0xff]   ;;  %v2281_v46 = vsel %vm1682_vm5, %v2276_v39, %v2280_v16 }
 0x226   : > { %4566 = vmatprep.subr.bf16.mxu0 %v4912_v36 }
 0x227   : > { %4553 = vmatpush3.bf16.msra.mxu1 %v4909_v45  ;;  %v2273_v45 = vsel %vm1682_vm5, %v2268_v9, %v2272_v32  ;;  %v4957_v32 = vld [vmem:[%s6405_s4 + $0x1c0] sm:$0xff]  }
 0x228   : > { %4554 = vmatprep.subr.bf16.mxu1 %v4911_v55  ;;  %4535 = vmatmul.mubr.bf16.vlgmr.msra.gmra.mxu0 %v1870_v59 }
 0x229   : > { %4538 = vmatprep.mubr.bf16.mxu0 %v1872_v60  ;;  %4567 = vmatpush3.bf16.msra.mxu0 %v4912_v36  ;;  %v5642_v36 = vld [vmem:[#allocation2 + $0xc] sm:$0xf]  ;;  %v2284_v60 = vor.u32 %v2282_v56, %v2280_v16  ;;  %v4965_v56 = vld [vmem:[%s6405_s4 + $0x218] sm:$0xff]  }
 0x22a   : > { %4568 = vmatprep.subr.bf16.mxu0 %v4914_v58  ;;  %v4064_v59 = vcombine.low %v2735_v48, %v5642_v36  ;;  %v2810_v48 = vrot.slane %v2808_v37, 1 }
 0x22b   : > { %4555 = vmatpush3.bf16.msra.mxu1 %v4911_v55  ;;  %v4935_v55 = vld [vmem:[%s6405_s4 + $0x140] sm:$0xff]  }
 0x22c   : > { %4556 = vmatprep.subr.bf16.mxu1 %v4913_v62  ;;  %v2787_v2 = vshll.u32 %v4064_v59, 16 }
 0x22d   : > { %4569 = vmatpush3.bf16.msra.mxu0 %v4914_v58  ;;  %v4939_v58 = vld [vmem:[%s6405_s4 + $0x1a8] sm:$0xff]  }
 0x22e   : > { %4570 = vmatprep.subr.bf16.mxu0 %v4917_v0  ;;  %v2789_v49 = vrot.slane %v2787_v2, 1  ;;  %v4967_v2 = vld [vmem:[%s6405_s4 + $0x208] sm:$0xff]  }
 0x22f   : > { %4557 = vmatpush3.bf16.msra.mxu1 %v4913_v62  ;;  %v4937_v62 = vld [vmem:[%s6405_s4 + $0x1f8] sm:$0xff]  }
 0x230   : > { %4590 = vmatprep.subr.bf16.mxu1 %v4916_v3  ;;  %4539 = vmatmul.mubr.bf16.gmra.mxu0 %v1874_v5  ;;  %v2440_v5 = vsel %vm1865_vm6, %v2437_v61, %v2439_v63  ;;  %v4950_v61 = vld [vmem:[%s6405_s4 + $0x188] sm:$0xff]   ;;  %v4966_v63 = vld [vmem:[%s6405_s4 + $0x210] sm:$0xff]  }
 0x231   : > { %4571 = vmatpush3.bf16.msra.mxu0 %v4917_v0  ;;  %4582 = vmatprep.mubr.bf16.mxu0 %v2265_v17  ;;  %v2288_v0 = vrot.slane %v2286_v28, 1  ;;  %v2812_v28 = vshrl.u32 %v5719_v33, 16 }
 0x232   : > { %4559 = vmatmul.mubr.bf16.vlgmr.msra.gmra.mxu1 %v3955_v7  ;;  %4572 = vmatprep.subr.bf16.mxu0 %v4921_v11  ;;  %v2785_v7 = vshrl.u32 %v4064_v59, 16 }
 0x233   : > { %4562 = vmatprep.mubr.bf16.mxu1 %v3956_v12  ;;  %4591 = vmatpush3.bf16.msra.mxu1 %v4916_v3  ;;  %v2289_v3 = vsel %vm1682_vm5, %v2284_v60, %v2288_v0  ;;  %v2814_v59 = vor.u32 %v2812_v28, %v2810_v48  ;;  %v5766_v0 = vld [vmem:[%s6407_s6 + $0x68] sm:$0xff] }
 0x234   : > { %4592 = vmatprep.subr.bf16.mxu1 %v4920_v8  ;;  %v2790_v12 = vor.u32 %v2789_v49, %v2785_v7  ;;  %6463 = vst [vmem:[#allocation6_spill] sm:$0xff] %v5766_v0  ;;  %v2971_v49 = vrot.slane %v5719_v33, 1  ;;  %v5827_v7 = vld [vmem:[%s6407_s6 + $0x30] sm:$0xff] }
 0x235   : > { %4573 = vmatpush3.bf16.msra.mxu0 %v4921_v11  ;;  %v5667_v11 = vld [vmem:[#allocation2 + $0x10] sm:$0xff]   ;;  %6470 = vst [vmem:[#allocation13_spill] sm:$0xff] %v5827_v7 }
 0x236   : > { %4574 = vmatprep.subr.bf16.mxu0 %v4923_v27  ;;  %v2792_v17 = vshll.u32 %v5667_v11, 16 }
 0x237   : > { %4593 = vmatpush3.bf16.msra.mxu1 %v4920_v8  ;;  %v2443_v8 = vrot.slane %v4938_v41, 1 }
 0x238   : > { %4594 = vmatprep.subr.bf16.mxu1 %v4922_v53  ;;  %v2794_v47 = vrot.slane %v2792_v17, 1 }
 0x239   : > { %4575 = vmatpush3.bf16.msra.mxu0 %v4923_v27  ;;  %v4948_v27 = vld [vmem:[%s6405_s4 + $0x190] sm:$0xff]   ;;  %v2444_v14 = vsel %vm1865_vm6, %v2441_v1, %v2443_v8 }
 0x23a   : > { %4563 = vmatmul.mubr.bf16.gmra.mxu1 %v3957_v42  ;;  %4576 = vmatprep.subr.bf16.mxu0 %v4926_v15  ;;  %v2795_v40 = vsel %vm1682_vm5, %v2790_v12, %v2794_v47  ;;  %v4952_v42 = vld [vmem:[%s6405_s4 + $0x180] sm:$0xff]   ;;  %v5838_v12 = vld [vmem:[%s6407_s6 + $0x28] sm:$0xff] }
 0x23b   : > { %4595 = vmatpush3.bf16.msra.mxu1 %v4922_v53  ;;  %4606 = vmatprep.mubr.bf16.mxu1 %v2438_v22  ;;  %v4947_v53 = vld [vmem:[%s6405_s4 + $0x1e0] sm:$0xff]   ;;  %v5703_v22 = vld [vmem:[#allocation2 + $0x18] sm:$0xff]   ;;  %6471 = vst [vmem:[#allocation14_spill] sm:$0xff] %v5838_v12 }
 0x23c   : > { %4596 = vmatprep.subr.bf16.mxu1 %v4925_v18  ;;  %v2800_v29 = vshll.u32 %v5703_v22, 16  ;;  %v2804_v34 = vshrl.u32 %v5703_v22, 16 }
 0x23d   : > { %4577 = vmatpush3.bf16.msra.mxu0 %v4926_v15  ;;  %v4949_v15 = vld [vmem:[%s6405_s4 + $0x1d8] sm:$0xff]  }
 0x23e   : > { %4578 = vmatprep.subr.bf16.mxu0 %v4928_v35  ;;  %v2802_v54 = vrot.slane %v2800_v29, 1  ;;  %v5933_v29 = vld [vmem:[%s6406_s5] sm:$0xff]  }
 0x23f   : > { %4597 = vmatpush3.bf16.msra.mxu1 %v4925_v18  ;;  %v4951_v18 = vld [vmem:[%s6405_s4 + $0x1d0] sm:$0xff]   ;;  %6477 = vst [vmem:[#allocation20_spill] sm:$0xff] %v5933_v29 }
 0x240   : > { %4598 = vmatprep.subr.bf16.mxu1 %v4927_v24  ;;  %v2806_v16 = vor.u32 %v2804_v34, %v2802_v54 }
 0x241   : > { %4579 = vmatpush3.bf16.msra.mxu0 %v4928_v35  ;;  %v4953_v35 = vld [vmem:[%s6405_s4 + $0x1c8] sm:$0xff]  }
 0x242   : > { %4580 = vmatprep.subr.bf16.mxu0 %v4930_v26 }
 0x243   : > { %4599 = vmatpush3.bf16.msra.mxu1 %v4927_v24  ;;  %v2945_v24 = vld [vmem:[#allocation2 + $0x8] sm:$0xe] }
 0x244   : > { %4600 = vmatprep.subr.bf16.mxu1 %v4929_v31  ;;  %v4093_v51 = vcombine.low %v2945_v24, %v5642_v36 }
 0x245   : > { %4581 = vmatpush3.bf16.msra.mxu0 %v4930_v26  ;;  %v4958_v26 = vld [vmem:[%s6405_s4 + $0x230] sm:$0xff]  }
 0x246   : > { %4614 = vmatprep.subr.bf16.mxu0 %v4933_v21  ;;  %v2966_v9 = vrot.slane %v4093_v51, 1 }
 0x247   : > { %4601 = vmatpush3.bf16.msra.mxu1 %v4929_v31  ;;  %v4038_v31 = vcombine.low %v5591_v13, %v5611_v23  ;;  %v2796_v13 = vshrl.u32 %v5667_v11, 16  ;;  %v2578_v23 = vld [vmem:[#allocation2 + $0x24] sm:$0xf] }
 0x248   : > { %4602 = vmatprep.subr.bf16.mxu1 %v4931_v38  ;;  %4583 = vmatmul.mubr.bf16.vlgmr.msra.gmra.mxu0 %v2273_v45  ;;  %v4039_v41 = vcombine.low %v5613_v30, %v2578_v23  ;;  %v5733_v45 = vld [vmem:[#allocation2 + $0x28] ss:$0 sps:$4 sm:$0x11]  }
 0x249   : > { %4586 = vmatprep.mubr.bf16.mxu0 %v2281_v46  ;;  %4615 = vmatpush3.bf16.msra.mxu0 %v4933_v21  ;;  %v4961_v21 = vld [vmem:[%s6405_s4 + $0x228] sm:$0xff]   ;;  %v2798_v39 = vor.u32 %v2796_v13, %v2794_v47  ;;  %v2816_v30 = vshll.u32 %v5733_v45, 16  ;;  %v5858_v47 = vld [vmem:[%s6407_s6 + $0x18] sm:$0xff] }
 0x24a   : > { %4616 = vmatprep.subr.bf16.mxu0 %v4936_v44  ;;  %6473 = vst [vmem:[#allocation16_spill] sm:$0xff] %v5858_v47 }
 0x24b   : > { %4603 = vmatpush3.bf16.msra.mxu1 %v4931_v38  ;;  %v2967_v38 = vrot.slane %v5667_v11, 1  ;;  %v2803_v46 = vsel %vm1682_vm5, %v2798_v39, %v2802_v54  ;;  %v2818_v60 = vrot.slane %v2816_v30, 1  ;;  %v2973_v11 = vrot.slane %v5733_v45, 1 }
 0x24c   : > { %4604 = vmatprep.subr.bf16.mxu1 %v4935_v55 }
 0x24d   : > { %4617 = vmatpush3.bf16.msra.mxu0 %v4936_v44  ;;  %v4963_v44 = vld [vmem:[%s6405_s4 + $0x220] sm:$0xff]   ;;  %v2968_v36 = vsel %vm1865_vm6, %v2966_v9, %v2967_v38  ;;  %v2819_v1 = vsel %vm1682_vm5, %v2814_v59, %v2818_v60  ;;  %v5990_v59 = vpop.permute.xlu0 %1579 }
 0x24e   : > { %4618 = vmatprep.subr.bf16.mxu0 %v4939_v58 }
 0x24f   : > { %4605 = vmatpush3.bf16.msra.mxu1 %v4935_v55  ;;  %v2811_v55 = vsel %vm1682_vm5, %v2806_v16, %v2810_v48 }
 0x250   : > { %4638 = vmatprep.subr.bf16.mxu1 %v4937_v62  ;;  %4587 = vmatmul.mubr.bf16.gmra.mxu0 %v2289_v3  ;;  %v5786_v3 = vld [vmem:[%s6407_s6 + $0x58] sm:$0xff] }
 0x251   : > { %4619 = vmatpush3.bf16.msra.mxu0 %v4939_v58  ;;  %4630 = vmatprep.mubr.bf16.mxu0 %v4036_v6  ;;  %v5749_v58 = vld [vmem:[%s6407_s6 + $0x78] sm:$0xff]  ;;  %6465 = vst [vmem:[#allocation8_spill] sm:$0xff] %v5786_v3  ;;  %v4968_v6 = vld [vmem:[%s6405_s4 + $0x200] sm:$0xff]  }
 0x252   : > { %4607 = vmatmul.mubr.bf16.vlgmr.msra.gmra.mxu1 %v2440_v5  ;;  %4620 = vmatprep.subr.bf16.mxu0 %v4942_v50  ;;  %6461 = vst [vmem:[#allocation4_spill] sm:$0xff] %v5749_v58  ;;  %v5803_v5 = vld [vmem:[%s6407_s6 + $0x48] sm:$0xff] }
 0x253   : > { %4610 = vmatprep.mubr.bf16.mxu1 %v2442_v10  ;;  %4639 = vmatpush3.bf16.msra.mxu1 %v4937_v62  ;;  %v5756_v62 = vld [vmem:[%s6407_s6 + $0x70] sm:$0xff]  ;;  %6467 = vst [vmem:[#allocation10_spill] sm:$0xff] %v5803_v5  ;;  %v5810_v10 = vld [vmem:[%s6407_s6 + $0x40] sm:$0xff] }
 0x254   : > { %4640 = vmatprep.subr.bf16.mxu1 %v4941_v4  ;;  %6462 = vst [vmem:[#allocation5_spill] sm:$0xff] %v5756_v62  ;;  %6468 = vst [vmem:[#allocation11_spill] sm:$0xff] %v5810_v10 }
 0x255   : > { %4621 = vmatpush3.bf16.msra.mxu0 %v4942_v50  ;;  %v5774_v50 = vld [vmem:[%s6407_s6 + $0x60] sm:$0xff] }
 0x256   : > { %4622 = vmatprep.subr.bf16.mxu0 %v4944_v43  ;;  %6464 = vst [vmem:[#allocation7_spill] sm:$0xff] %v5774_v50 }
 0x257   : > { %4641 = vmatpush3.bf16.msra.mxu1 %v4941_v4  ;;  %v5796_v4 = vld [vmem:[%s6407_s6 + $0x50] sm:$0xff] }
 0x258   : > { %4642 = vmatprep.subr.bf16.mxu1 %v4943_v57  ;;  %6466 = vst [vmem:[#allocation9_spill] sm:$0xff] %v5796_v4 }
 0x259   : > { %4623 = vmatpush3.bf16.msra.mxu0 %v4944_v43  ;;  %v2969_v43 = vrot.slane %v5703_v22, 1 }
 0x25a   : > { %4611 = vmatmul.mubr.bf16.gmra.mxu1 %v2444_v14  ;;  %4624 = vmatprep.subr.bf16.mxu0 %v4948_v27  ;;  %v5868_v14 = vld [vmem:[%s6407_s6 + $0x10] sm:$0xff] }
 0x25b   : > { %4643 = vmatpush3.bf16.msra.mxu1 %v4943_v57  ;;  %4654 = vmatprep.mubr.bf16.mxu1 %v2795_v40  ;;  %v5819_v57 = vld [vmem:[%s6407_s6 + $0x38] sm:$0xff]  ;;  %v2970_v17 = vsel %vm1865_vm6, %v2967_v38, %v2969_v43  ;;  %v2972_v8 = vsel %vm1865_vm6, %v2969_v43, %v2971_v49  ;;  %6474 = vst [vmem:[#allocation17_spill] sm:$0xff] %v5868_v14  ;;  %v5878_v40 = vld [vmem:[%s6407_s6 + $0x8] sm:$0xff]  ;;  %v6002_v43 = vpop.permute.xlu0 %1584 }
 0x25c   : > { %4644 = vmatprep.subr.bf16.mxu1 %v4947_v53  ;;  %6469 = vst [vmem:[#allocation12_spill] sm:$0xff] %v5819_v57  ;;  %6475 = vst [vmem:[#allocation18_spill] sm:$0xff] %v5878_v40 }
 0x25d   : > { %4625 = vmatpush3.bf16.msra.mxu0 %v4948_v27  ;;  %v5849_v27 = vld [vmem:[%s6407_s6 + $0x20] sm:$0xff] }
 0x25e   : > { %4626 = vmatprep.subr.bf16.mxu0 %v4950_v61  ;;  %6472 = vst [vmem:[#allocation15_spill] sm:$0xff] %v5849_v27 }
 0x25f   : > { %4645 = vmatpush3.bf16.msra.mxu1 %v4947_v53  ;;  %v2974_v53 = vsel %vm1865_vm6, %v2971_v49, %v2973_v11  ;;  %v6010_v11 = vpop.permute.xlu0 %1999 }
 0x260   : > { %4646 = vmatprep.subr.bf16.mxu1 %v4949_v15 }
 0x261   : > { %4627 = vmatpush3.bf16.msra.mxu0 %v4950_v61  ;;  %v5887_v61 = vld [vmem:[%s6407_s6] sm:$0xff] }
 0x262   : > { %4628 = vmatprep.subr.bf16.mxu0 %v4952_v42  ;;  %6476 = vst [vmem:[#allocation19_spill] sm:$0xff] %v5887_v61 }
 0x263   : > { %4647 = vmatpush3.bf16.msra.mxu1 %v4949_v15 }
 0x264   : > { %4648 = vmatprep.subr.bf16.mxu1 %v4951_v18 }
 0x265   : > { %4629 = vmatpush3.bf16.msra.mxu0 %v4952_v42 }
 0x266   : > { %4662 = vmatprep.subr.bf16.mxu0 %v4955_v19 }
 0x267   : > { %4649 = vmatpush3.bf16.msra.mxu1 %v4951_v18 }
 0x268   : > { %4650 = vmatprep.subr.bf16.mxu1 %v4953_v35  ;;  %4631 = vmatmul.mubr.bf16.vlgmr.msra.gmra.mxu0 %v4037_v25 }
 0x269   : > { %4634 = vmatprep.mubr.bf16.mxu0 %v4038_v31  ;;  %4663 = vmatpush3.bf16.msra.mxu0 %v4955_v19 }
 0x26a   : > { %4664 = vmatprep.subr.bf16.mxu0 %v4958_v26 }
 0x26b   : > { %4651 = vmatpush3.bf16.msra.mxu1 %v4953_v35 }
 0x26c   : > { %4652 = vmatprep.subr.bf16.mxu1 %v4957_v32 }
 0x26d   : > { %4665 = vmatpush3.bf16.msra.mxu0 %v4958_v26 }
 0x26e   : > { %4666 = vmatprep.subr.bf16.mxu0 %v4961_v21 }
 0x26f   : > { %4653 = vmatpush3.bf16.msra.mxu1 %v4957_v32 }
 0x270   : > { %4635 = vmatmul.mubr.bf16.gmra.mxu0 %v4039_v41  ;;  %4686 = vmatprep.subr.mxu1 %v6417_v20 }
 0x271   : > { %4667 = vmatpush3.bf16.msra.mxu0 %v4961_v21  ;;  %4678 = vmatprep.mubr.bf16.mxu0 %v2968_v36 }
 0x272   : > { %4655 = vmatmul.mubr.bf16.vlgmr.msra.gmra.mxu1 %v2803_v46  ;;  %4668 = vmatprep.subr.bf16.mxu0 %v4963_v44 }
 0x273   : > { %4658 = vmatprep.mubr.bf16.mxu1 %v2811_v55  ;;  %4687 = vmatpush3.msra.mxu1 %v5749_v58 }
 0x274   : > { %4688 = vmatprep.subr.mxu1 %v6417_v20 }
 0x275   : > { %4669 = vmatpush3.bf16.msra.mxu0 %v4963_v44  ;;  %4689 = vmatpush3.msra.mxu1 %v5756_v62 }
 0x276   : > { %4670 = vmatprep.subr.bf16.mxu0 %v4965_v56  ;;  %4690 = vmatprep.subr.mxu1 %v6417_v20 }
 0x277   : > { %4691 = vmatpush3.msra.mxu1 %v5766_v0 }
 0x278   : > { %4692 = vmatprep.subr.mxu1 %v6417_v20 }
 0x279   : > { %4671 = vmatpush3.bf16.msra.mxu0 %v4965_v56  ;;  %4693 = vmatpush3.msra.mxu1 %v5774_v50 }
 0x27a   : > { %4659 = vmatmul.mubr.bf16.gmra.mxu1 %v2819_v1  ;;  %4672 = vmatprep.subr.bf16.mxu0 %v4966_v63 }
 0x27b   : > { %4694 = vmatprep.subr.mxu1 %v6417_v20  ;;  %4718 = vmatprep.mubr.msk.f32.mxu1 %vm5005_vm1, %v6417_v20 }
 0x27c   : > { %4695 = vmatpush3.msra.mxu1 %v5786_v3 }
 0x27d   : > { %4673 = vmatpush3.bf16.msra.mxu0 %v4966_v63  ;;  %4696 = vmatprep.subr.mxu1 %v6417_v20  ;;  %v5994_v63 = vpop.permute.xlu1 %1589 }
 0x27e   : > { %4674 = vmatprep.subr.bf16.mxu0 %v4967_v2  ;;  %4697 = vmatpush3.msra.mxu1 %v5796_v4 }
 0x27f   : > { %4698 = vmatprep.subr.mxu1 %v6417_v20 }
 0x280   : > { %4699 = vmatpush3.msra.mxu1 %v5803_v5 }
 0x281   : > { %4675 = vmatpush3.bf16.msra.mxu0 %v4967_v2  ;;  %4700 = vmatprep.subr.mxu1 %v6417_v20  ;;  %v6004_v49 = vpop.permute.xlu1 %1994 }
 0x282   : > { %4676 = vmatprep.subr.bf16.mxu0 %v4968_v6  ;;  %4701 = vmatpush3.msra.mxu1 %v5810_v10 }
 0x283   : > { %4702 = vmatprep.subr.mxu1 %v6417_v20 }
 0x284   : > { %4703 = vmatpush3.msra.mxu1 %v5819_v57 }
 0x285   : > { %4677 = vmatpush3.bf16.msra.mxu0 %v4968_v6  ;;  %4704 = vmatprep.subr.mxu1 %v6417_v20 }
 0x286   : > { %4721 = vmatprep.subr.mxu0 %v6417_v20  ;;  %4705 = vmatpush3.msra.mxu1 %v5827_v7 }
 0x287   : > { %4706 = vmatprep.subr.mxu1 %v6417_v20 }
 0x288   : > { %4679 = vmatmul.mubr.bf16.vlgmr.msra.gmra.mxu0 %v2970_v17  ;;  %4707 = vmatpush3.msra.mxu1 %v5838_v12 }
 0x289   : > { %4682 = vmatprep.mubr.bf16.mxu0 %v2972_v8  ;;  %4722 = vmatpush3.msra.mxu0 %v5749_v58 }
 0x28a   : > { %4723 = vmatprep.subr.mxu0 %v6417_v20  ;;  %4708 = vmatprep.subr.mxu1 %v6417_v20 }
 0x28b   : > { %4724 = vmatpush3.msra.mxu0 %v5756_v62  ;;  %4709 = vmatpush3.msra.mxu1 %v5849_v27 }
 0x28c   : > { %4725 = vmatprep.subr.mxu0 %v6417_v20  ;;  %4710 = vmatprep.subr.mxu1 %v6417_v20 }
 0x28d   : > { %4726 = vmatpush3.msra.mxu0 %v5766_v0  ;;  %4711 = vmatpush3.msra.mxu1 %v5858_v47 }
 0x28e   : > { %4727 = vmatprep.subr.mxu0 %v6417_v20  ;;  %4712 = vmatprep.subr.mxu1 %v6417_v20 }
 0x28f   : > { %4728 = vmatpush3.msra.mxu0 %v5774_v50  ;;  %4713 = vmatpush3.msra.mxu1 %v5868_v14 }
 0x290   : > { %4683 = vmatmul.mubr.bf16.gmra.mxu0 %v2974_v53  ;;  %4729 = vmatprep.subr.mxu0 %v6417_v20 }
 0x291   : > { %4730 = vmatpush3.msra.mxu0 %v5786_v3  ;;  %4714 = vmatprep.subr.mxu1 %v6417_v20 }
 0x292   : > { %4731 = vmatprep.subr.mxu0 %v6417_v20  ;;  %4715 = vmatpush3.msra.mxu1 %v5878_v40 }
 0x293   : > { %4732 = vmatpush3.msra.mxu0 %v5796_v4  ;;  %4716 = vmatprep.subr.mxu1 %v6417_v20 }
 0x294   : > { %4733 = vmatprep.subr.mxu0 %v6417_v20  ;;  %4717 = vmatpush3.msra.mxu1 %v5887_v61 }
 0x295   : > { %4734 = vmatpush3.msra.mxu0 %v5803_v5  ;;  %4753 = vmatprep.mubr.msk.f32.mxu0 %vm5005_vm1, %v6417_v20 }
 0x296   : > { %4735 = vmatprep.subr.mxu0 %v6417_v20  ;;  %4756 = vmatprep.subr.bf16.mxu1 %v5933_v29 }
 0x297   : > { %4736 = vmatpush3.msra.mxu0 %v5810_v10 }
 0x298   : > { %4737 = vmatprep.subr.mxu0 %v6417_v20 }
 0x299   : > { %4738 = vmatpush3.msra.mxu0 %v5819_v57 }
 0x29a   : > { %4739 = vmatprep.subr.mxu0 %v6417_v20 }
 0x29b   : > { %4740 = vmatpush3.msra.mxu0 %v5827_v7 }
 0x29c   : > { %4741 = vmatprep.subr.mxu0 %v6417_v20 }
 0x29d   : > { %4742 = vmatpush3.msra.mxu0 %v5838_v12 }
 0x29e   : > { %4743 = vmatprep.subr.mxu0 %v6417_v20 }
 0x29f   : > { %4744 = vmatpush3.msra.mxu0 %v5849_v27 }
 0x2a0   : > { %4745 = vmatprep.subr.mxu0 %v6417_v20 }
 0x2a1   : > { %4746 = vmatpush3.msra.mxu0 %v5858_v47 }
 0x2a2   : > { %4747 = vmatprep.subr.mxu0 %v6417_v20 }
 0x2a3   : > { %4748 = vmatpush3.msra.mxu0 %v5868_v14 }
 0x2a4   : > { %4749 = vmatprep.subr.mxu0 %v6417_v20 }
 0x2a5   : > { %4750 = vmatpush3.msra.mxu0 %v5878_v40 }
 0x2a6   : > { %4751 = vmatprep.subr.mxu0 %v6417_v20 }
 0x2a7   : > { %4752 = vmatpush3.msra.mxu0 %v5887_v61  ;;  %v6018_v61 = vpop.permute.xlu0 %2004 }
 0x2a8   : > { %4801 = vmatprep.subr.mxu0 %v6417_v20  ;;  %v6014_v20 = vpop.permute.xlu1 %1594 }
 0x2ab   : > { %v6030_v7 = vpop.permute.xlu0 %2009 }
 0x2ac   : > { %v6024_v47 = vpop.permute.xlu1 %1599 }
 0x2af   : > { %v6040_v3 = vpop.permute.xlu0 %2014 }
 0x2b0   : > { %v6034_v10 = vpop.permute.xlu1 %1604 }
 0x2b3   : > { %v6050_v29 = vpop.permute.xlu0 %2019 }
 0x2b4   : > { %v6046_v62 = vpop.permute.xlu1 %1609 }
 0x2c8   : > { %v5912_v15 = vpop.f32.mrf.mxu0 }
 0x2ca   : > { %v5914_v42 = vpop.f32.mrf.mxu0 }
 0x2cc   : > { %v5916_v18 = vpop.f32.mrf.mxu0 }
 0x2ce   : > { %v5918_v19 = vpop.f32.mrf.mxu0 }
 0x2d2   : > { %v5920_v22 = vpop.f32.mrf.mxu1 }
 0x2d3   : > { %v5922_v35 = vpop.f32.mrf.mxu0 }
 0x2d4   : > { %v5924_v24 = vpop.f32.mrf.mxu1 }
 0x2d5   : > { %v5926_v25 = vpop.f32.mrf.mxu0 }
 0x2d6   : > { %v5928_v26 = vpop.f32.mrf.mxu1 }
 0x2d7   : > { %v5936_v31 = vpop.f32.mrf.mxu0 }
 0x2d8   : > { %v5938_v32 = vpop.f32.mrf.mxu1 }
 0x2d9   : > { %v5940_v33 = vpop.f32.mrf.mxu0 }
 0x2dd   : > { %v5942_v51 = vpop.f32.mrf.mxu1 }
 0x2df   : > { %v5952_v21 = vpop.f32.mrf.mxu1 }
 0x2e1   : > { %v5956_v23 = vpop.f32.mrf.mxu1 }
 0x2e3   : > { %v5960_v37 = vpop.f32.mrf.mxu1 }
 0x2e8   : > { %v5944_v54 = vpop.f32.mrf.mxu0 }
 0x2ea   : > { %v5954_v13 = vpop.f32.mrf.mxu0 }
 0x2ec   : > { %v5958_v34 = vpop.f32.mrf.mxu0 }
 0x2ee   : > { %v5962_v9 = vpop.f32.mrf.mxu0 }
 0x2f0   : > { %v5966_v39 = vpop.f32.mrf.mxu0 }
 0x2f2   : > { %v5964_v38 = vpop.f32.mrf.mxu1  ;;  %v5970_v16 = vpop.f32.mrf.mxu0 }
 0x2f4   : > { %v5968_v41 = vpop.f32.mrf.mxu1  ;;  %v5974_v45 = vpop.f32.mrf.mxu0 }
 0x2f6   : > { %v5972_v44 = vpop.f32.mrf.mxu1  ;;  %v5978_v36 = vpop.f32.mrf.mxu0 }
 0x2f8   : > { %v5976_v48 = vpop.f32.mrf.mxu1 }
 0x2fa   : > { %v5980_v46 = vpop.f32.mrf.mxu1 }
 0x2fc   : > { %v5984_v55 = vpop.f32.mrf.mxu1 }
 0x2fe   : > { %v5988_v28 = vpop.f32.mrf.mxu1 }
 0x300   : > { %v5996_v1 = vpop.f32.mrf.mxu1 }
 0x308   : > { %v5982_v30 = vpop.f32.mrf.mxu0 }
 0x30a   : > { %v5986_v56 = vpop.f32.mrf.mxu0 }
 0x30c   : > { %v5992_v60 = vpop.f32.mrf.mxu0 }
 0x30e   : > { %v5998_v2 = vpop.f32.mrf.mxu0 }
 0x30f   : > { %6478 = vst [vmem:[#allocation21_spill] sm:$0xff] %v5998_v2  ;;  %v6078_v2 = vpop.permute.xlu0 %2024 }
 0x310   : > { %v6006_v17 = vpop.f32.mrf.mxu0 }
 0x311   : > { %6479 = vst [vmem:[#allocation22_spill] sm:$0xff] %v6006_v17 }
 0x312   : > { %v6000_v6 = vpop.f32.mrf.mxu1  ;;  %v6012_v53 = vpop.f32.mrf.mxu0 }
 0x313   : > { %6480 = vst [vmem:[#allocation23_spill] sm:$0xff] %v6012_v53  ;;  %v6058_v53 = vpop.permute.xlu1 %1614 }
 0x314   : > { %v6008_v8 = vpop.f32.mrf.mxu1  ;;  %v6020_v40 = vpop.f32.mrf.mxu0 }
 0x315   : > { %6481 = vst [vmem:[#allocation24_spill] sm:$0xff] %v6020_v40 }
 0x316   : > { %v6016_v52 = vpop.f32.mrf.mxu1  ;;  %v6026_v27 = vpop.f32.mrf.mxu0 }
 0x317   : > { %6482 = vst [vmem:[#allocation25_spill] sm:$0xff] %v6026_v27  ;;  %v1619_v27 = vmul.f32 %v5912_v15, %v5994_v63  ;;  %v1623_v15 = vmul.f32 %v5922_v35, %v6046_v62  ;;  %v6086_v35 = vpop.permute.xlu1 %2029 }
 0x318   : > { %v6022_v14 = vpop.f32.mrf.mxu1 }
 0x31a   : > { %v6028_v12 = vpop.f32.mrf.mxu1 }
 0x31b   : > { %6483 = vst [vmem:[#allocation26_spill] sm:$0xff] %v6028_v12 }
 0x31c   : > { %v6036_v5 = vpop.f32.mrf.mxu1 }
 0x31e   : > { %v6042_v50 = vpop.f32.mrf.mxu1 }
 0x31f   : > { %6485 = vst [vmem:[#allocation28_spill] sm:$0xff] %v6042_v50  ;;  %v1617_v50 = vmul.f32 %v5990_v59, %v5914_v42  ;;  %v1621_v42 = vmul.f32 %v6024_v47, %v5926_v25 }
 0x320   : > { %v6048_v58 = vpop.f32.mrf.mxu1 }
 0x321   : > { %6487 = vst [vmem:[#allocation30_spill] sm:$0xff] %v6048_v58  ;;  %v1618_v58 = vmul.f32 %v6002_v43, %v5918_v19 }
 0x323   : > { %v1837_v19 = vadd.f32 %v5938_v32, %v1618_v58  ;;  %v2033_v32 = vmul.f32 %v6010_v11, %v5962_v9  ;;  %v2190_v9 = vmul.f32 %v5976_v48, %v6002_v43  ;;  %v2194_v48 = vmul.f32 %v5996_v1, %v6034_v10 }
 0x328   : > { %v6032_v57 = vpop.f32.mrf.mxu0 }
 0x329   : > { %6484 = vst [vmem:[#allocation27_spill] sm:$0xff] %v6032_v57 }
 0x32a   : > { %v6038_v4 = vpop.f32.mrf.mxu0 }
 0x32c   : > { %v6044_v0 = vpop.f32.mrf.mxu0 }
 0x32d   : > { %6486 = vst [vmem:[#allocation29_spill] sm:$0xff] %v6044_v0  ;;  %v1620_v0 = vmul.f32 %v5916_v18, %v6014_v20 }
 0x32e   : > { %v6052_v40 = vpop.f32.mrf.mxu0 }
 0x32f   : > { %6488 = vst [vmem:[#allocation31_spill] sm:$0xff] %v6052_v40  ;;  %v1838_v40 = vadd.f32 %v5920_v22, %v1619_v27  ;;  %v1839_v18 = vadd.f32 %v5928_v26, %v1620_v0  ;;  %v1622_v27 = vmul.f32 %v6034_v10, %v5940_v33  ;;  %v2034_v22 = vmul.f32 %v5944_v54, %v6018_v61 }
 0x330   : > { %v6062_v17 = vpop.f32.mrf.mxu0  ;;  %v2035_v26 = vmul.f32 %v5958_v34, %v6030_v7  ;;  %v2038_v33 = vmul.f32 %v5966_v39, %v6078_v2  ;;  %v2191_v54 = vmul.f32 %v5964_v38, %v5994_v63  ;;  %v2037_v39 = vmul.f32 %v6050_v29, %v5978_v36 }
 0x331   : > { %6490 = vst [vmem:[#allocation33_spill] sm:$0xff] %v6062_v17  ;;  %v1624_v17 = vmul.f32 %v5936_v31, %v6058_v53  ;;  %v2032_v31 = vmul.f32 %v6004_v49, %v5954_v13  ;;  %v1841_v58 = vadd.f32 %v5960_v37, %v1622_v27  ;;  %v2036_v13 = vmul.f32 %v6040_v3, %v5970_v16 }
 0x332   : > { %v6054_v12 = vpop.f32.mrf.mxu1  ;;  %v6093_v0 = vpop.f32.mrf.mxu0  ;;  %v2042_v34 = vadd.f32 %v2034_v22, %v1838_v40  ;;  %v2192_v37 = vmul.f32 %v5972_v44, %v6014_v20  ;;  %v2193_v16 = vmul.f32 %v5984_v55, %v6024_v47  ;;  %v2041_v44 = vadd.f32 %v2033_v32, %v1837_v19 }
 0x333   : > { %6489 = vst [vmem:[#allocation32_spill] sm:$0xff] %v6054_v12  ;;  %v1836_v12 = vadd.f32 %v5924_v24, %v1617_v50  ;;  %v1842_v50 = vadd.f32 %v5942_v51, %v1623_v15  ;;  %v1840_v24 = vadd.f32 %v5952_v21, %v1621_v42  ;;  %v1843_v25 = vadd.f32 %v5956_v23, %v1624_v17 }
 0x334   : > { %v6069_v57 = vpop.f32.mrf.mxu1  ;;  %v2189_v21 = vmul.f32 %v5968_v41, %v5990_v59  ;;  %v2039_v23 = vmul.f32 %v5974_v45, %v6086_v35  ;;  %v2195_v41 = vmul.f32 %v5980_v46, %v6046_v62  ;;  %v2196_v45 = vmul.f32 %v5988_v28, %v6058_v53  ;;  %v6124_v40 = vpop.f32.mrf.mxu0 }
 0x335   : > { %v2040_v38 = vadd.f32 %v2032_v31, %v1836_v12  ;;  %v2043_v17 = vadd.f32 %v2035_v26, %v1839_v18  ;;  %v2046_v15 = vadd.f32 %v2038_v33, %v1842_v50  ;;  %v2044_v36 = vadd.f32 %v2036_v13, %v1840_v24 }
 0x336   : > { %v6102_v51 = vpop.f32.mrf.mxu1  ;;  %v2047_v12 = vadd.f32 %v2039_v23, %v1843_v25  ;;  %v2199_v27 = vadd.f32 %v2191_v54, %v2042_v34  ;;  %v2045_v46 = vadd.f32 %v2037_v39, %v1841_v58  ;;  %v2562_v55 = vmul.f32 %v6008_v8, %v6004_v49  ;;  %v2707_v26 = vpop.f32.mrf.mxu0  ;;  %v6493_v23 = vld [vmem:[#allocation27_spill] sm:$0xff] }
 0x337   : > { %6491 = vst [vmem:[#allocation34_spill] sm:$0xff] %v6102_v51  ;;  %v2197_v22 = vadd.f32 %v2189_v21, %v2040_v38  ;;  %v2200_v31 = vadd.f32 %v2192_v37, %v2043_v17  ;;  %v2198_v51 = vadd.f32 %v2190_v9, %v2041_v44  ;;  %v2564_v28 = vmul.f32 %v6000_v6, %v6018_v61  ;;  %v6492_v21 = vld [vmem:[#allocation21_spill] sm:$0xff] }
 0x338   : > { %v2909_v42 = vpop.f32.mrf.mxu1  ;;  %v2203_v18 = vadd.f32 %v2195_v41, %v2046_v15  ;;  %v2201_v19 = vadd.f32 %v2193_v16, %v2044_v36  ;;  %v2204_v50 = vadd.f32 %v2196_v45, %v2047_v12  ;;  %v2563_v24 = vmul.f32 %v6022_v14, %v6010_v11  ;;  %v6498_v16 = vld [vmem:[#allocation25_spill] sm:$0xff]  ;;  %v6499_v15 = vld [vmem:[#allocation26_spill] sm:$0xff] }
 0x339   : > { %v2407_v1 = vadd.f32 %v5986_v56, %v2197_v22  ;;  %v2202_v25 = vadd.f32 %v2194_v48, %v2045_v46  ;;  %v2719_v58 = vmul.f32 %v6038_v4, %v5990_v59  ;;  %v2409_v8 = vadd.f32 %v5982_v30, %v2199_v27  ;;  %v6494_v4 = vld [vmem:[#allocation31_spill] sm:$0xff]  ;;  %v6495_v30 = vld [vmem:[#allocation22_spill] sm:$0xff] }
 0x33a   : > { %v6137_v32 = vpop.f32.mrf.mxu1  ;;  %v2410_v33 = vadd.f32 %v5992_v60, %v2200_v31  ;;  %v2565_v6 = vmul.f32 %v6016_v52, %v6030_v7  ;;  %v2566_v54 = vmul.f32 %v6036_v5, %v6040_v3  ;;  %v2408_v13 = vadd.f32 %v6492_v21, %v2198_v51  ;;  %v6496_v60 = vld [vmem:[#allocation23_spill] sm:$0xff]  ;;  %v6497_v52 = vld [vmem:[#allocation29_spill] sm:$0xff]  ;;  %v6500_v31 = vld [vmem:[#allocation28_spill] sm:$0xff] }
 0x33b   : > { %v2570_v14 = vadd.f32 %v2562_v55, %v2407_v1  ;;  %v2721_v34 = vmul.f32 %v6493_v23, %v5994_v63  ;;  %v2720_v59 = vmul.f32 %v6494_v4, %v6002_v43  ;;  %v2572_v37 = vadd.f32 %v2564_v28, %v2409_v8 }
 0x33c   : > { %v2413_v9 = vadd.f32 %v6495_v30, %v2203_v18  ;;  %v2411_v39 = vadd.f32 %v6496_v60, %v2201_v19  ;;  %v2722_v38 = vmul.f32 %v6497_v52, %v6014_v20  ;;  %v2571_v5 = vadd.f32 %v2563_v24, %v2408_v13  ;;  %v2922_v17 = vpop.f32.mrf.mxu1  ;;  %v6502_v24 = vld [vmem:[#allocation32_spill] sm:$0xff] }
 0x33d   : > { %v2412_v45 = vadd.f32 %v6498_v16, %v2202_v25  ;;  %v2727_v51 = vadd.f32 %v2719_v58, %v2570_v14  ;;  %v2573_v63 = vadd.f32 %v2565_v6, %v2410_v33  ;;  %v2568_v43 = vmul.f32 %v6499_v15, %v6078_v2  ;;  %v6505_v13 = vld [vmem:[#allocation24_spill] sm:$0xff] }
 0x33e   : > { %v2574_v48 = vadd.f32 %v2566_v54, %v2411_v39  ;;  %v2723_v36 = vmul.f32 %v6093_v0, %v6024_v47  ;;  %v2729_v27 = vadd.f32 %v2721_v34, %v2572_v37  ;;  %v2728_v22 = vadd.f32 %v2720_v59, %v2571_v5  ;;  %v4661_v0 = vpop.f32.mrf.mxu1  ;;  %v6504_v33 = vld [vmem:[#allocation34_spill] sm:$0xff] }
 0x33f   : > { %v2937_v20 = vadd.f32 %v6069_v57, %v2727_v51  ;;  %v2569_v55 = vmul.f32 %v6500_v31, %v6086_v35  ;;  %v2730_v18 = vadd.f32 %v2722_v38, %v2573_v63  ;;  %v2724_v54 = vmul.f32 %v2707_v26, %v6034_v10 }
 0x340   : > { %v2939_v25 = vadd.f32 %v6502_v24, %v2729_v27  ;;  %v2938_v47 = vadd.f32 %v2909_v42, %v2728_v22  ;;  %v2576_v14 = vadd.f32 %v2568_v43, %v2413_v9  ;;  %v2925_v37 = vpop.f32.mrf.mxu1 }
 0x341   : > { %v2940_v6 = vadd.f32 %v6504_v33, %v2730_v18 }
 0x348   : > { %v4680_v56 = vpop.f32.mrf.mxu0 }
 0x349   : > { %v3094_v46 = vmul.f32 %v4680_v56, %v6018_v61  ;;  %v6503_v61 = vld [vmem:[#allocation33_spill] sm:$0xff]  ;;  %v2731_v56 = vadd.f32 %v2723_v36, %v2574_v48 }
 0x34a   : > { %v3061_v41 = vpop.f32.mrf.mxu0  ;;  %v2725_v8 = vmul.f32 %v6503_v61, %v6046_v62 }
 0x34b   : > { %v3092_v44 = vmul.f32 %v3061_v41, %v6004_v49  ;;  %v6501_v49 = vld [vmem:[#allocation30_spill] sm:$0xff]  ;;  %v6176_v23 = vadd.f32 %v3094_v46, %v2939_v25  ;;  %v2941_v4 = vadd.f32 %v2922_v17, %v2731_v56 }
 0x34c   : > { %v4681_v12 = vpop.f32.mrf.mxu0  ;;  %v2567_v28 = vmul.f32 %v6501_v49, %v6050_v29  ;;  %v2733_v60 = vadd.f32 %v2725_v8, %v2576_v14  ;;  %v4972_v14 = vld [vmem:[%s5950_s24 + $0x10] sm:$0xff]  }
 0x34d   : > { %v3095_v19 = vmul.f32 %v4681_v12, %v6030_v7  ;;  %v6168_v58 = vadd.f32 %v3092_v44, %v2937_v20  ;;  %v2414_v7 = vadd.f32 %v6505_v13, %v2204_v50  ;;  %v3123_v52 = vmul.f32 %v6176_v23, %v6176_v23  ;;  %v4971_v13 = vld [vmem:[%s5950_s24 + $0x8] sm:$0xff]  }
 0x34e   : > { %v3064_v1 = vpop.f32.mrf.mxu0  ;;  %v2575_v34 = vadd.f32 %v2567_v28, %v2412_v45  ;;  %v2943_v16 = vadd.f32 %v6137_v32, %v2733_v60  ;;  %v6516_v60 = vld [vmem:[#allocation12_spill] sm:$0xff] }
 0x34f   : > { %v3093_v57 = vmul.f32 %v3064_v1, %v6010_v11  ;;  %v2726_v11 = vmul.f32 %v6124_v40, %v6058_v53  ;;  %v6182_v59 = vadd.f32 %v3095_v19, %v2940_v6  ;;  %v3121_v10 = vmul.f32 %v6168_v58, %v6168_v58  ;;  %v4970_v6 = vld [vmem:[%s5950_s24] sm:$0xff]  }
 0x350   : > { %v4684_v21 = vpop.f32.mrf.mxu0  ;;  %v2577_v9 = vadd.f32 %v2569_v55, %v2414_v7  ;;  %v2732_v39 = vadd.f32 %v2724_v54, %v2575_v34  ;;  %v6506_v7 = vld [vmem:[#allocation20_spill] sm:$0xff]  ;;  %v6507_v34 = vmov 0.0  }
 0x351   : > { %v6178_v42 = vadd.f32 %v3093_v57, %v2938_v47  ;;  %v3098_v53 = vmul.f32 %v4684_v21, %v6078_v2 }
 0x352   : > { %v3077_v62 = vpop.f32.mrf.mxu0  ;;  %v2734_v45 = vadd.f32 %v2726_v11, %v2577_v9  ;;  %v2942_v51 = vadd.f32 %v2925_v37, %v2732_v39  ;;  %v6508_v11 = vld [vmem:[#allocation4_spill] sm:$0xff]  ;;  %v6510_v37 = vld [vmem:[#allocation6_spill] sm:$0xff]  ;;  %v6515_v9 = vld [vmem:[#allocation11_spill] sm:$0xff] }
 0x353   : > { %v3108_v50 = vadd.f32 %v6178_v42, %v6168_v58  ;;  %v3122_v26 = vmul.f32 %v6178_v42, %v6178_v42  ;;  %v3096_v30 = vmul.f32 %v3077_v62, %v6040_v3  ;;  %v3124_v3 = vmul.f32 %v6182_v59, %v6182_v59  ;;  %v4973_v62 = vld [vmem:[%s5950_s24 + $0x18] sm:$0xff]  }
 0x354   : > { %v4685_v40 = vpop.f32.mrf.mxu0  ;;  %v2944_v43 = vadd.f32 %v4661_v0, %v2734_v45  ;;  %v6203_v48 = vadd.f32 %v3098_v53, %v2943_v16  ;;  %v6517_v39 = vld [vmem:[#allocation13_spill] sm:$0xff]  ;;  %v6518_v53 = vld [vmem:[#allocation14_spill] sm:$0xff]  ;;  %v6523_v16 = vld [vmem:[#allocation19_spill] sm:$0xff] }
 0x355   : > { %v3109_v38 = vadd.f32 %v3108_v50, %v6176_v23  ;;  %v3129_v41 = vadd.f32 %v3122_v26, %v3121_v10  ;;  %v6195_v5 = vadd.f32 %v3096_v30, %v2941_v4  ;;  %v3099_v63 = vmul.f32 %v4685_v40, %v6086_v35  ;;  %v6509_v4 = vld [vmem:[#allocation5_spill] sm:$0xff]  ;;  %v6511_v10 = vld [vmem:[#allocation7_spill] sm:$0xff]  ;;  %v6512_v50 = vld [vmem:[#allocation8_spill] sm:$0xff] }
 0x356   : > { %v3080_v17 = vpop.f32.mrf.mxu0  ;;  %v6513_v26 = vld [vmem:[#allocation9_spill] sm:$0xff]  ;;  %v6514_v30 = vld [vmem:[#allocation10_spill] sm:$0xff]  ;;  %v6519_v40 = vld [vmem:[#allocation15_spill] sm:$0xff] }
 0x357   : > { %v3130_v44 = vadd.f32 %v3129_v41, %v3123_v52  ;;  %v3110_v2 = vadd.f32 %v3109_v38, %v6182_v59  ;;  %v3097_v15 = vmul.f32 %v3080_v17, %v6050_v29  ;;  %v3125_v32 = vmul.f32 %v6195_v5, %v6195_v5  ;;  %v6520_v52 = vld [vmem:[#allocation16_spill] sm:$0xff]  ;;  %v6521_v38 = vld [vmem:[#allocation17_spill] sm:$0xff]  ;;  %v6522_v41 = vld [vmem:[#allocation18_spill] sm:$0xff] }
 0x358   : > { %v6210_v22 = vadd.f32 %v3099_v63, %v2944_v43  ;;  %v3127_v29 = vmul.f32 %v6203_v48, %v6203_v48 }
 0x359   : > { %v3111_v36 = vadd.f32 %v3110_v2, %v6195_v5  ;;  %v3131_v12 = vadd.f32 %v3130_v44, %v3124_v3  ;;  %v6208_v27 = vadd.f32 %v3097_v15, %v2942_v51 }
 0x35a   : > { %v3128_v49 = vmul.f32 %v6210_v22, %v6210_v22 }
 0x35b   : > { %v3132_v20 = vadd.f32 %v3131_v12, %v3125_v32  ;;  %v3112_v46 = vadd.f32 %v3111_v36, %v6208_v27  ;;  %v3126_v35 = vmul.f32 %v6208_v27, %v6208_v27 }
 0x35d   : > { %v3113_v31 = vadd.f32 %v3112_v46, %v6203_v48  ;;  %v3133_v55 = vadd.f32 %v3132_v20, %v3126_v35 }
 0x35f   : > { %v3114_v28 = vadd.f32 %v3113_v31, %v6210_v22  ;;  %v3134_v18 = vadd.f32 %v3133_v55, %v3127_v29 }
 0x361   : > { %v3115_v19 = vrot.slane %v3114_v28, 4  ;;  %v3135_v1 = vadd.f32 %v3134_v18, %v3128_v49 }
 0x363   : > { %v3116_v24 = vadd.f32 %v3115_v19, %v3114_v28  ;;  %v3136_v25 = vrot.slane %v3135_v1, 4 }
 0x365   : > { %v3117_v47 = vrot.slane %v3116_v24, 2  ;;  %v3137_v0 = vadd.f32 %v3136_v25, %v3135_v1 }
 0x367   : > { %v3118_v57 = vadd.f32 %v3117_v47, %v3116_v24  ;;  %v3138_v61 = vrot.slane %v3137_v0, 2 }
 0x369   : > { %v3119_v8 = vrot.slane %v3118_v57, 1  ;;  %v3139_v33 = vadd.f32 %v3138_v61, %v3137_v0  ;;  %v6524_v61 = vld [vmem:[#allocation3_spill] sm:$0xff] }
 0x36b   : > { %v3120_v54 = vadd.f32 %v3119_v8, %v3118_v57  ;;  %v3140_v56 = vrot.slane %v3139_v33, 1 }
 0x36d   : > { %4719 = vmatmul.mubr.f32.vlgmr.msra.gmra.mxu1 %v3120_v54  ;;  %v3141_v21 = vadd.f32 %v3140_v56, %v3139_v33  ;;  %v3286_v33 = vld [vmem:[%s6412_s11] sm:$0x1] }
 0x36e   : > { %4757 = vmatpush3.bf16.msra.mxu1 %v6506_v7  ;;  %4758 = vmatprep.mubr.msk.bf16.mxu1 %vm599_vm0, %v4970_v6 }
 0x36f   : > { %4754 = vmatmul.mubr.f32.vlgmr.msra.gmra.mxu0 %v3141_v21  ;;  %4766 = vmatprep.subr.mxu1 %v6507_v34 }
 0x370   : > { %4802 = vmatpush3.msra.mxu0 %v6508_v11  ;;  %4833 = vmatprep.mubr.msk.f32.mxu0 %vm5005_vm1, %v6507_v34 }
 0x371   : > { %4759 = vmatmul.mubr.msk.bf16.vlgmr.msra.gmra.mxu1 %vm599_vm0, %v4971_v13  ;;  %4803 = vmatprep.subr.mxu0 %v6507_v34 }
 0x372   : > { %4762 = vmatprep.mubr.msk.bf16.mxu1 %vm599_vm0, %v4972_v14  ;;  %4767 = vmatpush3.msra.mxu1 %v6508_v11 }
 0x373   : > { %4768 = vmatprep.subr.mxu1 %v6507_v34  ;;  %4804 = vmatpush3.msra.mxu0 %v6509_v4 }
 0x374   : > { %4769 = vmatpush3.msra.mxu1 %v6509_v4  ;;  %4805 = vmatprep.subr.mxu0 %v6507_v34 }
 0x375   : > { %4770 = vmatprep.subr.mxu1 %v6507_v34  ;;  %4806 = vmatpush3.msra.mxu0 %v6510_v37 }
 0x376   : > { %4771 = vmatpush3.msra.mxu1 %v6510_v37  ;;  %4807 = vmatprep.subr.mxu0 %v6507_v34 }
 0x377   : > { %4772 = vmatprep.subr.mxu1 %v6507_v34  ;;  %4808 = vmatpush3.msra.mxu0 %v6511_v10 }
 0x378   : > { %4773 = vmatpush3.msra.mxu1 %v6511_v10  ;;  %4809 = vmatprep.subr.mxu0 %v6507_v34 }
 0x379   : > { %4763 = vmatmul.mubr.msk.bf16.gmra.mxu1 %vm599_vm0, %v4973_v62  ;;  %4774 = vmatprep.subr.mxu1 %v6507_v34 }
 0x37a   : > { %4775 = vmatpush3.msra.mxu1 %v6512_v50  ;;  %4810 = vmatpush3.msra.mxu0 %v6512_v50 }
 0x37b   : > { %4776 = vmatprep.subr.mxu1 %v6507_v34  ;;  %4811 = vmatprep.subr.mxu0 %v6507_v34 }
 0x37c   : > { %4777 = vmatpush3.msra.mxu1 %v6513_v26  ;;  %4812 = vmatpush3.msra.mxu0 %v6513_v26 }
 0x37d   : > { %4778 = vmatprep.subr.mxu1 %v6507_v34  ;;  %4813 = vmatprep.subr.mxu0 %v6507_v34 }
 0x37e   : > { %4779 = vmatpush3.msra.mxu1 %v6514_v30  ;;  %4814 = vmatpush3.msra.mxu0 %v6514_v30 }
 0x37f   : > { %4780 = vmatprep.subr.mxu1 %v6507_v34  ;;  %4815 = vmatprep.subr.mxu0 %v6507_v34 }
 0x380   : > { %4781 = vmatpush3.msra.mxu1 %v6515_v9  ;;  %4816 = vmatpush3.msra.mxu0 %v6515_v9 }
 0x381   : > { %4782 = vmatprep.subr.mxu1 %v6507_v34  ;;  %4817 = vmatprep.subr.mxu0 %v6507_v34 }
 0x382   : > { %4783 = vmatpush3.msra.mxu1 %v6516_v60  ;;  %4818 = vmatpush3.msra.mxu0 %v6516_v60 }
 0x383   : > { %4784 = vmatprep.subr.mxu1 %v6507_v34  ;;  %4819 = vmatprep.subr.mxu0 %v6507_v34 }
 0x384   : > { %4785 = vmatpush3.msra.mxu1 %v6517_v39  ;;  %4820 = vmatpush3.msra.mxu0 %v6517_v39 }
 0x385   : > { %4786 = vmatprep.subr.mxu1 %v6507_v34  ;;  %4821 = vmatprep.subr.mxu0 %v6507_v34 }
 0x386   : > { %4787 = vmatpush3.msra.mxu1 %v6518_v53  ;;  %4822 = vmatpush3.msra.mxu0 %v6518_v53 }
 0x387   : > { %4788 = vmatprep.subr.mxu1 %v6507_v34  ;;  %4823 = vmatprep.subr.mxu0 %v6507_v34 }
 0x388   : > { %4789 = vmatpush3.msra.mxu1 %v6519_v40  ;;  %4824 = vmatpush3.msra.mxu0 %v6519_v40 }
 0x389   : > { %4790 = vmatprep.subr.mxu1 %v6507_v34  ;;  %4825 = vmatprep.subr.mxu0 %v6507_v34 }
 0x38a   : > { %4791 = vmatpush3.msra.mxu1 %v6520_v52  ;;  %4826 = vmatpush3.msra.mxu0 %v6520_v52 }
 0x38b   : > { %4792 = vmatprep.subr.mxu1 %v6507_v34  ;;  %4827 = vmatprep.subr.mxu0 %v6507_v34 }
 0x38c   : > { %4793 = vmatpush3.msra.mxu1 %v6521_v38  ;;  %4828 = vmatpush3.msra.mxu0 %v6521_v38 }
 0x38d   : > { %4794 = vmatprep.subr.mxu1 %v6507_v34  ;;  %4829 = vmatprep.subr.mxu0 %v6507_v34 }
 0x38e   : > { %4795 = vmatpush3.msra.mxu1 %v6522_v41  ;;  %4798 = vmatprep.mubr.msk.f32.mxu1 %vm5005_vm1, %v6507_v34 }
 0x38f   : > { %4796 = vmatprep.subr.mxu1 %v6507_v34  ;;  %4830 = vmatpush3.msra.mxu0 %v6522_v41 }
 0x390   : > { %4797 = vmatpush3.msra.mxu1 %v6523_v16  ;;  %4831 = vmatprep.subr.mxu0 %v6507_v34 }
 0x391   : > { %4832 = vmatpush3.msra.mxu0 %v6523_v16 }
 0x42d   : > { %v3208_v45 = vpop.f32.mrf.mxu1 }
 0x42e   : > { %v3282_v51 = vmul.f32 %v3208_v45, %v3208_v45  ;;  %v3291_v8 = vrot.slane %v3208_v45, %v6524_v61 }
 0x42f   : > { %v4720_v3 = vpop.f32.mrf.mxu1  ;;  %v3278_v17 = vpop.f32.mrf.mxu0 }
 0x430   : > { %v3283_v63 = vsub.f32 %v3278_v17, %v3282_v51  ;;  %v3292_v7 = vsub.f32 %v6168_v58, %v3291_v8  ;;  %v3293_v14 = vsub.f32 %v6178_v42, %v3291_v8  ;;  %v3294_v34 = vsub.f32 %v6176_v23, %v3291_v8 }
 0x431   : > { %v4755_v44 = vpop.f32.mrf.mxu0  ;;  %v6297_v2 = vpop.f32.mrf.mxu1  ;;  %v3295_v11 = vsub.f32 %v6182_v59, %v3291_v8  ;;  %v3296_v4 = vsub.f32 %v6195_v5, %v3291_v8  ;;  %v3297_v50 = vsub.f32 %v6208_v27, %v3291_v8  ;;  %v3298_v26 = vsub.f32 %v6203_v48, %v3291_v8 }
 0x432   : > { %v3284_v43 = vadd.f32 1e-05, %v3283_v63  ;;  %v3479_v29 = vmul.f32 %v6297_v2, %v6297_v2  ;;  %v3299_v30 = vsub.f32 %v6210_v22, %v3291_v8 }
 0x433   : > { %v6299_v15 = vpop.f32.mrf.mxu1 }
 0x434   : > { %4976 = vrsqrt.f32 %v3284_v43  ;;  %v3477_v12 = vmul.f32 %v6299_v15, %v6299_v15 }
 0x435   : > { %v6301_v36 = vpop.f32.mrf.mxu1 }
 0x436   : > { %v3480_v28 = vmul.f32 %v6301_v36, %v6301_v36 }
 0x437   : > { %v6303_v32 = vpop.f32.mrf.mxu1 }
 0x438   : > { %v3464_v20 = vadd.f32 %v6303_v32, %v6299_v15  ;;  %v3478_v46 = vmul.f32 %v6303_v32, %v6303_v32 }
 0x439   : > { %v6311_v35 = vpop.f32.mrf.mxu1 }
 0x43a   : > { %v3465_v31 = vadd.f32 %v6297_v2, %v3464_v20  ;;  %v3485_v55 = vadd.f32 %v3478_v46, %v3477_v12  ;;  %v3483_v58 = vmul.f32 %v6311_v35, %v6311_v35 }
 0x43b   : > { %v6316_v49 = vpop.f32.mrf.mxu1 }
 0x43c   : > { %v3486_v18 = vadd.f32 %v3485_v55, %v3479_v29  ;;  %v3466_v19 = vadd.f32 %v6301_v36, %v3465_v31  ;;  %v3481_v0 = vmul.f32 %v6316_v49, %v6316_v49 }
 0x43d   : > { %v6321_v1 = vpop.f32.mrf.mxu1 }
 0x43e   : > { %v3467_v24 = vadd.f32 %v3466_v19, %v6316_v49  ;;  %v3487_v25 = vadd.f32 %v3486_v18, %v3480_v28  ;;  %v3484_v27 = vmul.f32 %v6321_v1, %v6321_v1  ;;  %v4102_v18 = vld [vmem:[%s6413_s12] ss:$0 sm:$0xff] }
 0x43f   : > { %v6324_v47 = vpop.f32.mrf.mxu1 }
 0x440   : > { %v3468_v57 = vadd.f32 %v3467_v24, %v6324_v47  ;;  %v3488_v6 = vadd.f32 %v3487_v25, %v3481_v0  ;;  %v3482_v56 = vmul.f32 %v6324_v47, %v6324_v47 }
 0x441   : > { %v4977_v21 = vpop.eup %4976 }
 0x442   : > { %v3469_v54 = vadd.f32 %v6311_v35, %v3468_v57  ;;  %v3287_v13 = vmul.f32 %v4977_v21, %v3286_v33  ;;  %v3489_v10 = vadd.f32 %v3488_v6, %v3482_v56 }
 0x444   : > { %v3303_v62 = vrot.slane %v3287_v13, %v6524_v61  ;;  %v3470_v37 = vadd.f32 %v6321_v1, %v3469_v54  ;;  %v3490_v52 = vadd.f32 %v3489_v10, %v3483_v58 }
 0x446   : > { %v3304_v42 = vmul.f32 %v3303_v62, %v3292_v7  ;;  %v3305_v23 = vmul.f32 %v3303_v62, %v3293_v14  ;;  %v3306_v9 = vmul.f32 %v3303_v62, %v3294_v34  ;;  %v3307_v59 = vmul.f32 %v3303_v62, %v3295_v11  ;;  %v3642_v11 = vld [vmem:[%s6414_s13] sm:$0x1] }
 0x447   : > { %v3308_v60 = vmul.f32 %v3303_v62, %v3296_v4  ;;  %v3309_v5 = vmul.f32 %v3303_v62, %v3297_v50  ;;  %v3310_v39 = vmul.f32 %v3303_v62, %v3298_v26  ;;  %v3311_v53 = vmul.f32 %v3303_v62, %v3299_v30 }
 0x448   : > { %v3471_v40 = vrot.slane %v3470_v37, 4  ;;  %v3491_v48 = vadd.f32 %v3490_v52, %v3484_v27  ;;  %v3319_v19 = vadd.f32 %v4102_v18, %v3304_v42  ;;  %v3320_v24 = vadd.f32 %v4102_v18, %v3305_v23 }
 0x449   : > { %v3321_v25 = vadd.f32 %v4102_v18, %v3306_v9  ;;  %v3322_v0 = vadd.f32 %v4102_v18, %v3307_v59  ;;  %v3323_v57 = vadd.f32 %v4102_v18, %v3308_v60  ;;  %v3324_v8 = vadd.f32 %v4102_v18, %v3309_v5 }
 0x44a   : > { %v3472_v38 = vadd.f32 %v3471_v40, %v3470_v37  ;;  %v3492_v22 = vrot.slane %v3491_v48, 4  ;;  %v6353_v33 = vadd.f32 %v4102_v18, %v3310_v39  ;;  %v6355_v6 = vadd.f32 %v4102_v18, %v3311_v53 }
 0x44b   : > { %vm3327_vm0 = vcmp.ge.f32.partialorder %v3319_v19, 0.0  ;;  %vm3328_vm1 = vcmp.ge.f32.partialorder %v3320_v24, 0.0  ;;  %vm3329_vm4 = vcmp.ge.f32.partialorder %v3321_v25, 0.0  ;;  %v3335_v54 = vmul.f32 0.2, %v3319_v19 }
 0x44c   : > { %v3473_v41 = vrot.slane %v3472_v38, 2  ;;  %v3493_v45 = vadd.f32 %v3492_v22, %v3491_v48  ;;  %v3336_v56 = vmul.f32 0.2, %v3320_v24  ;;  %v3337_v21 = vmul.f32 0.2, %v3321_v25 }
 0x44d   : > { %v3338_v13 = vmul.f32 0.2, %v3322_v0  ;;  %v3339_v7 = vmul.f32 0.2, %v3323_v57  ;;  %v3340_v14 = vmul.f32 0.2, %v3324_v8  ;;  %v3343_v10 = vsel %vm3327_vm0, %v3319_v19, %v3335_v54 }
 0x44e   : > { %v3474_v16 = vadd.f32 %v3473_v41, %v3472_v38  ;;  %v3494_v3 = vrot.slane %v3493_v45, 2  ;;  %vm3330_vm7 = vcmp.ge.f32.partialorder %v3322_v0, 0.0  ;;  %vm3331_vm8 = vcmp.ge.f32.partialorder %v3323_v57, 0.0 }
 0x44f   : > { %vm3332_vm9 = vcmp.ge.f32.partialorder %v3324_v8, 0.0  ;;  %vm3333_vm10 = vcmp.ge.f32.partialorder %v6353_v33, 0.0  ;;  %v3341_v62 = vmul.f32 0.2, %v6353_v33  ;;  %v3342_v37 = vmul.f32 0.2, %v6355_v6 }
 0x450   : > { %v3475_v51 = vrot.slane %v3474_v16, 1  ;;  %v3495_v44 = vadd.f32 %v3494_v3, %v3493_v45  ;;  %vm3334_vm11 = vcmp.ge.f32.partialorder %v6355_v6, 0.0  ;;  %v3344_v50 = vsel %vm3328_vm1, %v3320_v24, %v3336_v56 }
 0x451   : > { %v3345_v26 = vsel %vm3329_vm4, %v3321_v25, %v3337_v21  ;;  %v3346_v58 = vsel %vm3330_vm7, %v3322_v0, %v3338_v13  ;;  %v3347_v42 = vsel %vm3331_vm8, %v3323_v57, %v3339_v7  ;;  %v3348_v23 = vsel %vm3332_vm9, %v3324_v8, %v3340_v14 }
 0x452   : > { %v3476_v17 = vadd.f32 %v3475_v51, %v3474_v16  ;;  %v3496_v63 = vrot.slane %v3495_v44, 1 }
 0x454   : > { %4799 = vmatmul.mubr.f32.vlgmr.msra.gmra.mxu1 %v3476_v17  ;;  %v3497_v43 = vadd.f32 %v3496_v63, %v3495_v44  ;;  %v3349_v17 = vsel %vm3333_vm10, %v6353_v33, %v3341_v62 }
 0x456   : > { %4834 = vmatmul.mubr.f32.vlgmr.msra.gmra.mxu0 %v3497_v43 }
 0x514   : > { %v3564_v12 = vpop.f32.mrf.mxu1 }
 0x515   : > { %v3638_v20 = vmul.f32 %v3564_v12, %v3564_v12  ;;  %v3647_v34 = vrot.slane %v3564_v12, %v6524_v61  ;;  %v3350_v12 = vsel %vm3334_vm11, %v6355_v6, %v3342_v37 }
 0x516   : > { %v4800_v46 = vpop.f32.mrf.mxu1  ;;  %v3634_v29 = vpop.f32.mrf.mxu0 }
 0x517   : > { %v3639_v31 = vsub.f32 %v3634_v29, %v3638_v20  ;;  %v3648_v9 = vsub.f32 %v6299_v15, %v3647_v34  ;;  %v3649_v59 = vsub.f32 %v6303_v32, %v3647_v34  ;;  %v3650_v60 = vsub.f32 %v6297_v2, %v3647_v34  ;;  %v4112_v15 = vld [vmem:[%s6415_s14] ss:$0 sm:$0xff] }
 0x518   : > { %v4835_v55 = vpop.f32.mrf.mxu0  ;;  %v3651_v5 = vsub.f32 %v6301_v36, %v3647_v34  ;;  %v3652_v53 = vsub.f32 %v6316_v49, %v3647_v34  ;;  %v3653_v40 = vsub.f32 %v6324_v47, %v3647_v34  ;;  %v3654_v52 = vsub.f32 %v6311_v35, %v3647_v34 }
 0x519   : > { %v3640_v28 = vadd.f32 1e-05, %v3639_v31  ;;  %v3655_v27 = vsub.f32 %v6321_v1, %v3647_v34 }
 0x51b   : > { %4978 = vrsqrt.f32 %v3640_v28 }
 0x528   : > { %v4979_v4 = vpop.eup %4978 }
 0x529   : > { %v3643_v30 = vmul.f32 %v4979_v4, %v3642_v11 }
 0x52b   : > { %v3659_v39 = vrot.slane %v3643_v30, %v6524_v61 }
 0x52d   : > { %v3660_v38 = vmul.f32 %v3659_v39, %v3648_v9  ;;  %v3661_v32 = vmul.f32 %v3659_v39, %v3649_v59  ;;  %v3662_v48 = vmul.f32 %v3659_v39, %v3650_v60  ;;  %v3663_v2 = vmul.f32 %v3659_v39, %v3651_v5 }
 0x52e   : > { %v3664_v41 = vmul.f32 %v3659_v39, %v3652_v53  ;;  %v3665_v36 = vmul.f32 %v3659_v39, %v3653_v40  ;;  %v3666_v22 = vmul.f32 %v3659_v39, %v3654_v52  ;;  %v3667_v61 = vmul.f32 %v3659_v39, %v3655_v27 }
 0x52f   : > { %v3675_v16 = vadd.f32 %v4112_v15, %v3660_v38  ;;  %v3676_v49 = vadd.f32 %v4112_v15, %v3661_v32  ;;  %v3677_v45 = vadd.f32 %v4112_v15, %v3662_v48  ;;  %v3678_v47 = vadd.f32 %v4112_v15, %v3663_v2 }
 0x530   : > { %v3679_v51 = vadd.f32 %v4112_v15, %v3664_v41  ;;  %v3680_v35 = vadd.f32 %v4112_v15, %v3665_v36  ;;  %v3681_v3 = vadd.f32 %v4112_v15, %v3666_v22  ;;  %v3682_v1 = vadd.f32 %v4112_v15, %v3667_v61 }
 0x531   : > { %vm3683_vm12 = vcmp.ge.f32.partialorder %v3675_v16, 0.0  ;;  %vm3684_vm13 = vcmp.ge.f32.partialorder %v3676_v49, 0.0  ;;  %vm3685_vm14 = vcmp.ge.f32.partialorder %v3677_v45, 0.0  ;;  %vm3686_vm15 = vcmp.ge.f32.partialorder %v3678_v47, 0.0 }
 0x532   : > { %vm3687_vm2 = vcmp.ge.f32.partialorder %v3679_v51, 0.0  ;;  %vm3688_vm3 = vcmp.ge.f32.partialorder %v3680_v35, 0.0  ;;  %vm3689_vm5 = vcmp.ge.f32.partialorder %v3681_v3, 0.0  ;;  %vm3690_vm6 = vcmp.ge.f32.partialorder %v3682_v1, 0.0 }
 0x533   : > { %v3691_v44 = vmul.f32 0.2, %v3675_v16  ;;  %v3692_v63 = vmul.f32 0.2, %v3676_v49  ;;  %v3693_v43 = vmul.f32 0.2, %v3677_v45 }
 0x534   : > { %v3694_v20 = vmul.f32 0.2, %v3678_v47  ;;  %v3695_v46 = vmul.f32 0.2, %v3679_v51  ;;  %v3696_v29 = vmul.f32 0.2, %v3680_v35 }
 0x535   : > { %v3697_v31 = vmul.f32 0.2, %v3681_v3  ;;  %v3698_v55 = vmul.f32 0.2, %v3682_v1  ;;  %v3699_v28 = vsel %vm3683_vm12, %v3675_v16, %v3691_v44  ;;  %v3700_v18 = vsel %vm3684_vm13, %v3676_v49, %v3692_v63 }
 0x536   : > { %v3701_v19 = vsel %vm3685_vm14, %v3677_v45, %v3693_v43  ;;  %v3702_v24 = vsel %vm3686_vm15, %v3678_v47, %v3694_v20  ;;  %v3703_v25 = vsel %vm3687_vm2, %v3679_v51, %v3695_v46  ;;  %v3704_v0 = vsel %vm3688_vm3, %v3680_v35, %v3696_v29 }
 0x537   : > { %v3705_v57 = vsel %vm3689_vm5, %v3681_v3, %v3697_v31  ;;  %v3706_v8 = vsel %vm3690_vm6, %v3682_v1, %v3698_v55  ;;  %v3707_v33 = vadd.f32 %v3699_v28, %v3343_v10  ;;  %v3708_v6 = vadd.f32 %v3700_v18, %v3344_v50 }
 0x538   : > { %v3709_v54 = vadd.f32 %v3701_v19, %v3345_v26  ;;  %v3710_v56 = vadd.f32 %v3702_v24, %v3346_v58  ;;  %v3711_v21 = vadd.f32 %v3703_v25, %v3347_v42  ;;  %v3712_v13 = vadd.f32 %v3704_v0, %v3348_v23 }
 0x539   : > { %v3713_v7 = vadd.f32 %v3705_v57, %v3349_v17  ;;  %v3714_v14 = vadd.f32 %v3706_v8, %v3350_v12  ;;  %v3715_v34 = vmul.f32 0.5, %v3707_v33  ;;  %v3716_v11 = vmul.f32 0.5, %v3708_v6 }
 0x53a   : > { %v3717_v4 = vmul.f32 0.5, %v3709_v54  ;;  %v3718_v62 = vmul.f32 0.5, %v3710_v56  ;;  %v3719_v37 = vmul.f32 0.5, %v3711_v21  ;;  %v3720_v30 = vmul.f32 0.5, %v3712_v13 }
 0x53b   : > { %v3721_v9 = vmul.f32 0.5, %v3713_v7  ;;  %v3722_v59 = vmul.f32 0.5, %v3714_v14  ;;  %3723 = vst [vmem:[%s534_s22] sm:$0xff] %v3715_v34  ;;  %3724 = vst [vmem:[%s534_s22 + $0x8] sm:$0xff] %v3716_v11 }
 0x53c   : > { %3725 = vst [vmem:[%s534_s22 + $0x10] sm:$0xff] %v3717_v4  ;;  %3726 = vst [vmem:[%s534_s22 + $0x18] sm:$0xff] %v3718_v62 }
 0x53d   : > { %3727 = vst [vmem:[%s534_s22 + $0x20] sm:$0xff] %v3719_v37  ;;  %3728 = vst [vmem:[%s534_s22 + $0x28] sm:$0xff] %v3720_v30 }
 0x53e   : > { %3729 = vst [vmem:[%s534_s22 + $0x30] sm:$0xff] %v3721_v9  ;;  %3730 = vst [vmem:[%s534_s22 + $0x38] sm:$0xff] %v3722_v59 }
 0x53f PF: > { %s25_s18 = sadd.s32 1, %s5002_s18  }
 0x540   : > { %p22_p4 = scmp.ge.s32.totalorder %s25_s18, 4  }
 0x542   :  { %24 = sbr.rel (!%p22_p4) target bundleno = 1 (0x1), region = 127 }

</bundles_post_ra>
